<compile_context>
chip_gen: v6e
topology: v6e:2x2x1
jax: 0.10.0
libtpu: 0.0.40
codegen_flags: <defaults>
</compile_context>

<pallas_src>
import functools

import jax
import jax.numpy as jnp
from jax.experimental import pallas as pl
from jax.experimental.pallas import tpu as pltpu

# torch's sobel_h; sobel_v is its transpose (used only by the reference).
SOBEL_H = ((-1.0, -2.0, -1.0),
           ( 0.0,  0.0,  0.0),
           ( 1.0,  2.0,  1.0))


def _shift(x, offset, axis, valid_mask):
    """result[i] = x[i + offset] along `axis`, zero where i+offset is OOB.

    `valid_mask` is precomputed/hoisted by the caller (shared across all
    shifts), so each call is just an XLU roll plus a single VPU select.
    """
    n = x.shape[axis]
    rolled = pltpu.roll(x, shift=(-offset) % n, axis=axis)
    return jnp.where(valid_mask, rolled, 0.0)


def _grad_mag(x, eps, masks):
    """sqrt(gv^2 + gh^2 + eps) per image of an (B, H, W) block, zero-padded
    3x3 Sobel in separable form (cross-correlation, torch.conv2d semantics):

      S[r, c]  = x[r, c-1] + 2 x[r, c] + x[r, c+1]     (horizontal [1,2,1])
      D[r, c]  = x[r, c+1] - x[r, c-1]                 (horizontal [-1,0,1])
      gh[r, c] = S[r+1, c] - S[r-1, c]                 (sobel_h)
      gv[r, c] = D[r-1, c] + 2 D[r, c] + D[r+1, c]     (sobel_v = sobel_h.T)
    """
    col_gt0, col_ltW, row_gt0, row_ltH = masks
    xl = _shift(x, -1, 2, col_gt0)          # x[r, c-1]
    xr = _shift(x, +1, 2, col_ltW)          # x[r, c+1]
    s = xl + 2.0 * x + xr
    d = xr - xl
    gh = _shift(s, +1, 1, row_ltH) - _shift(s, -1, 1, row_gt0)
    gv = _shift(d, -1, 1, row_gt0) + 2.0 * d + _shift(d, +1, 1, row_ltH)
    return jnp.sqrt(gv * gv + gh * gh + eps)


def _mge_kernel(yp_ref, yt_ref, out_ref, *, eps):
    # Native-dtype load, promote to f32 in VMEM (halves HBM reads for bf16).
    yp = yp_ref[...].astype(jnp.float32)    # (B_BLK, H, W)
    yt = yt_ref[...].astype(jnp.float32)
    blk_shape = yp.shape
    _, H, W = blk_shape

    # Hoisted boundary masks: built once, shared by all 12 shifts below.
    row = jax.lax.broadcasted_iota(jnp.int32, blk_shape, 1)
    col = jax.lax.broadcasted_iota(jnp.int32, blk_shape, 2)
    masks = (col > 0, col < W - 1, row > 0, row < H - 1)

    ypg = _grad_mag(yp, eps, masks)
    ytg = _grad_mag(yt, eps, masks)
    diff = ytg - ypg
    d2 = diff * diff
    # Same forward value as torch's mask/eps dance:
    #   d2 == 0 -> 0 ; else -> sqrt(d2 + eps)
    out = jnp.where(d2 == 0.0, 0.0, jnp.sqrt(d2 + eps))
    # Lane-dense per-block partial sum (reduced over batch+rows); the tiny
    # remaining reduction over W and grid blocks happens in the wrapper.
    out_ref[...] = jnp.sum(out, axis=(0, 1), keepdims=True)


def _choose_batch_block(N, H, W):
    """Largest divisor of N whose per-step VMEM (inputs + roll temporaries)
    stays within a conservative budget, biased to leave >= 2 grid steps so
    both v7x TensorCores get work."""
    # Per image (f32): 2 input copies + ~10 full-size temporaries from the
    # roll/mask stencil.  Budget ~16 MiB of compute-side VMEM per step.
    bytes_per_image = 12 * H * W * 4
    budget = 16 * 1024 * 1024
    max_blk = max(1, budget // max(1, bytes_per_image))
    if N >= 2:
        max_blk = min(max_blk, max(1, N // 2))
    blk = 1
    for d in range(1, min(int(max_blk), N) + 1):
        if N % d == 0:
            blk = d
    return blk


def mge(y_p, y_t, eps=1e-18):
    """y_p, y_t: (N, 1, H, W) float (NCHW). Returns the scalar MGE loss."""
    N, C, H, W = y_p.shape
    assert C == 1, "MGE's (1,1,3,3) sobel weights require single-channel inputs"
    # TODO(synk): for very large H*W (single image + temporaries exceeding
    # ~16 MiB) add in-kernel row-band tiling with 1-row halos so a whole image
    # does not have to be resident in VMEM (needed for v7x's 64 MiB VMEM).
    yp = y_p.reshape(N, H, W)   # no wrapper-side cast: done in-kernel
    yt = y_t.reshape(N, H, W)

    b_blk = _choose_batch_block(N, H, W)
    n_blocks = N // b_blk

    kern = functools.partial(_mge_kernel, eps=eps)
    partials = pl.pallas_call(
        kern,
        out_shape=jax.ShapeDtypeStruct((n_blocks, 1, W), jnp.float32),
        grid=(n_blocks,),
        in_specs=[pl.BlockSpec((b_blk, H, W), lambda i: (i, 0, 0)),
                  pl.BlockSpec((b_blk, H, W), lambda i: (i, 0, 0))],
        out_specs=pl.BlockSpec((1, 1, W), lambda i: (i, 0, 0)),
        compiler_params=pltpu.CompilerParams(
            dimension_semantics=("parallel",),
            vmem_limit_bytes=32 * 1024 * 1024),
    )(yp, yt)
    return jnp.sum(partials) / (N * H * W)


def _mge_reference(y_p, y_t, eps=1e-18):
    """Pure-JAX reference (lax conv), mirrors the torch forward exactly."""
    sobel_h = jnp.array(SOBEL_H, jnp.float32)
    sobel_v = sobel_h.T
    w_h = sobel_h.reshape(1, 1, 3, 3)
    w_v = sobel_v.reshape(1, 1, 3, 3)

    def conv(x, w):
        return jax.lax.conv_general_dilated(
            x, w, window_strides=(1, 1), padding=((1, 1), (1, 1)),
            dimension_numbers=("NCHW", "OIHW", "NCHW"))

    yp = y_p.astype(jnp.float32)
    yt = y_t.astype(jnp.float32)
    ypg = jnp.sqrt(conv(yp, w_v) ** 2 + conv(yp, w_h) ** 2 + eps)
    ytg = jnp.sqrt(conv(yt, w_v) ** 2 + conv(yt, w_h) ** 2 + eps)
    out = (ytg - ypg) ** 2
    mask = (out == 0.0).astype(jnp.float32)
    out = out + mask * eps
    out = jnp.sqrt(out + eps) * (1.0 - mask)
    return jnp.mean(out)


if __name__ == "__main__":
    key = jax.random.PRNGKey(0)
    k1, k2 = jax.random.split(key)
    N, C, H, W = 2, 1, 128, 128
    y_p = jax.random.uniform(k1, (N, C, H, W), jnp.float32)
    y_t = jax.random.uniform(k2, (N, C, H, W), jnp.float32)

    result = jax.block_until_ready(mge(y_p, y_t))
    ref = jax.block_until_ready(_mge_reference(y_p, y_t))

    assert jnp.isfinite(result), "MGE result is not finite"
    assert jnp.allclose(result, ref, rtol=1e-5, atol=1e-6), (result, ref)
    print("KERNEL_OK")
</pallas_src>

<mosaic_0001>
module attributes {stable_mosaic.version = 11 : i64} {
  func.func @_mge_kernel(%arg0: i32, %arg1: memref<1x128x128xf32, #tpu.memory_space<vmem>>, %arg2: memref<1x128x128xf32, #tpu.memory_space<vmem>>, %arg3: memref<1x1x128xf32, #tpu.memory_space<vmem>>) attributes {dimension_semantics = [#tpu.dimension_semantics<parallel>], iteration_bounds = array<i64: 2>, scalar_prefetch = 0 : i64, scratch_operands = 0 : i64, tpu.core_type = #tpu.core_type<tc>, window_params = [{transform_indices = @transform_0, window_bounds = array<i64: 1, 128, 128>}, {transform_indices = @transform_1, window_bounds = array<i64: 1, 128, 128>}, {transform_indices = @transform_2, window_bounds = array<i64: 1, 1, 128>}]} {
    %c0 = arith.constant 0 : index
    %c0_0 = arith.constant 0 : index
    %c0_1 = arith.constant 0 : index
    %0 = vector.load %arg1[%c0, %c0_0, %c0_1] : memref<1x128x128xf32, #tpu.memory_space<vmem>>, vector<1x128x128xf32>
    %c0_2 = arith.constant 0 : index
    %c0_3 = arith.constant 0 : index
    %c0_4 = arith.constant 0 : index
    %1 = vector.load %arg2[%c0_2, %c0_3, %c0_4] : memref<1x128x128xf32, #tpu.memory_space<vmem>>, vector<1x128x128xf32>
    %2 = tpu.iota {dimensions = array<i32: 1>} : vector<1x128x128xi32>
    %3 = tpu.iota {dimensions = array<i32: 2>} : vector<1x128x128xi32>
    %c0_i32 = arith.constant 0 : i32
    %4 = vector.broadcast %c0_i32 : i32 to vector<1x128x128xi32>
    %5 = arith.cmpi sgt, %3, %4 : vector<1x128x128xi32>
    %c127_i32 = arith.constant 127 : i32
    %6 = vector.broadcast %c127_i32 : i32 to vector<1x128x128xi32>
    %7 = arith.cmpi slt, %3, %6 : vector<1x128x128xi32>
    %c0_i32_5 = arith.constant 0 : i32
    %8 = vector.broadcast %c0_i32_5 : i32 to vector<1x128x128xi32>
    %9 = arith.cmpi sgt, %2, %8 : vector<1x128x128xi32>
    %c127_i32_6 = arith.constant 127 : i32
    %10 = vector.broadcast %c127_i32_6 : i32 to vector<1x128x128xi32>
    %11 = arith.cmpi slt, %2, %10 : vector<1x128x128xi32>
    %c1_i32 = arith.constant 1 : i32
    %12 = tpu.dynamic_rotate %0 by %c1_i32 dim 2 : vector<1x128x128xf32>, i32 -> vector<1x128x128xf32>
    %cst = arith.constant 0.000000e+00 : f32
    %13 = vector.broadcast %cst : f32 to vector<1x128x128xf32>
    %14 = arith.select %5, %12, %13 : vector<1x128x128xi1>, vector<1x128x128xf32>
    %c127_i32_7 = arith.constant 127 : i32
    %15 = tpu.dynamic_rotate %0 by %c127_i32_7 dim 2 : vector<1x128x128xf32>, i32 -> vector<1x128x128xf32>
    %cst_8 = arith.constant 0.000000e+00 : f32
    %16 = vector.broadcast %cst_8 : f32 to vector<1x128x128xf32>
    %17 = arith.select %7, %15, %16 : vector<1x128x128xi1>, vector<1x128x128xf32>
    %cst_9 = arith.constant 2.000000e+00 : f32
    %18 = vector.broadcast %cst_9 : f32 to vector<1x128x128xf32>
    %19 = arith.mulf %18, %0 : vector<1x128x128xf32>
    %20 = arith.addf %14, %19 : vector<1x128x128xf32>
    %21 = arith.addf %20, %17 : vector<1x128x128xf32>
    %22 = arith.subf %17, %14 : vector<1x128x128xf32>
    %c127_i32_10 = arith.constant 127 : i32
    %23 = tpu.dynamic_rotate %21 by %c127_i32_10 dim 1 : vector<1x128x128xf32>, i32 -> vector<1x128x128xf32>
    %cst_11 = arith.constant 0.000000e+00 : f32
    %24 = vector.broadcast %cst_11 : f32 to vector<1x128x128xf32>
    %25 = arith.select %11, %23, %24 : vector<1x128x128xi1>, vector<1x128x128xf32>
    %c1_i32_12 = arith.constant 1 : i32
    %26 = tpu.dynamic_rotate %21 by %c1_i32_12 dim 1 : vector<1x128x128xf32>, i32 -> vector<1x128x128xf32>
    %cst_13 = arith.constant 0.000000e+00 : f32
    %27 = vector.broadcast %cst_13 : f32 to vector<1x128x128xf32>
    %28 = arith.select %9, %26, %27 : vector<1x128x128xi1>, vector<1x128x128xf32>
    %29 = arith.subf %25, %28 : vector<1x128x128xf32>
    %c1_i32_14 = arith.constant 1 : i32
    %30 = tpu.dynamic_rotate %22 by %c1_i32_14 dim 1 : vector<1x128x128xf32>, i32 -> vector<1x128x128xf32>
    %cst_15 = arith.constant 0.000000e+00 : f32
    %31 = vector.broadcast %cst_15 : f32 to vector<1x128x128xf32>
    %32 = arith.select %9, %30, %31 : vector<1x128x128xi1>, vector<1x128x128xf32>
    %cst_16 = arith.constant 2.000000e+00 : f32
    %33 = vector.broadcast %cst_16 : f32 to vector<1x128x128xf32>
    %34 = arith.mulf %33, %22 : vector<1x128x128xf32>
    %35 = arith.addf %32, %34 : vector<1x128x128xf32>
    %c127_i32_17 = arith.constant 127 : i32
    %36 = tpu.dynamic_rotate %22 by %c127_i32_17 dim 1 : vector<1x128x128xf32>, i32 -> vector<1x128x128xf32>
    %cst_18 = arith.constant 0.000000e+00 : f32
    %37 = vector.broadcast %cst_18 : f32 to vector<1x128x128xf32>
    %38 = arith.select %11, %36, %37 : vector<1x128x128xi1>, vector<1x128x128xf32>
    %39 = arith.addf %35, %38 : vector<1x128x128xf32>
    %40 = arith.mulf %39, %39 : vector<1x128x128xf32>
    %41 = arith.mulf %29, %29 : vector<1x128x128xf32>
    %42 = arith.addf %40, %41 : vector<1x128x128xf32>
    %cst_19 = arith.constant 1.000000e-18 : f32
    %43 = vector.broadcast %cst_19 : f32 to vector<1x128x128xf32>
    %44 = arith.addf %42, %43 : vector<1x128x128xf32>
    %45 = math.sqrt %44 : vector<1x128x128xf32>
    %c1_i32_20 = arith.constant 1 : i32
    %46 = tpu.dynamic_rotate %1 by %c1_i32_20 dim 2 : vector<1x128x128xf32>, i32 -> vector<1x128x128xf32>
    %cst_21 = arith.constant 0.000000e+00 : f32
    %47 = vector.broadcast %cst_21 : f32 to vector<1x128x128xf32>
    %48 = arith.select %5, %46, %47 : vector<1x128x128xi1>, vector<1x128x128xf32>
    %c127_i32_22 = arith.constant 127 : i32
    %49 = tpu.dynamic_rotate %1 by %c127_i32_22 dim 2 : vector<1x128x128xf32>, i32 -> vector<1x128x128xf32>
    %cst_23 = arith.constant 0.000000e+00 : f32
    %50 = vector.broadcast %cst_23 : f32 to vector<1x128x128xf32>
    %51 = arith.select %7, %49, %50 : vector<1x128x128xi1>, vector<1x128x128xf32>
    %cst_24 = arith.constant 2.000000e+00 : f32
    %52 = vector.broadcast %cst_24 : f32 to vector<1x128x128xf32>
    %53 = arith.mulf %52, %1 : vector<1x128x128xf32>
    %54 = arith.addf %48, %53 : vector<1x128x128xf32>
    %55 = arith.addf %54, %51 : vector<1x128x128xf32>
    %56 = arith.subf %51, %48 : vector<1x128x128xf32>
    %c127_i32_25 = arith.constant 127 : i32
    %57 = tpu.dynamic_rotate %55 by %c127_i32_25 dim 1 : vector<1x128x128xf32>, i32 -> vector<1x128x128xf32>
    %cst_26 = arith.constant 0.000000e+00 : f32
    %58 = vector.broadcast %cst_26 : f32 to vector<1x128x128xf32>
    %59 = arith.select %11, %57, %58 : vector<1x128x128xi1>, vector<1x128x128xf32>
    %c1_i32_27 = arith.constant 1 : i32
    %60 = tpu.dynamic_rotate %55 by %c1_i32_27 dim 1 : vector<1x128x128xf32>, i32 -> vector<1x128x128xf32>
    %cst_28 = arith.constant 0.000000e+00 : f32
    %61 = vector.broadcast %cst_28 : f32 to vector<1x128x128xf32>
    %62 = arith.select %9, %60, %61 : vector<1x128x128xi1>, vector<1x128x128xf32>
    %63 = arith.subf %59, %62 : vector<1x128x128xf32>
    %c1_i32_29 = arith.constant 1 : i32
    %64 = tpu.dynamic_rotate %56 by %c1_i32_29 dim 1 : vector<1x128x128xf32>, i32 -> vector<1x128x128xf32>
    %cst_30 = arith.constant 0.000000e+00 : f32
    %65 = vector.broadcast %cst_30 : f32 to vector<1x128x128xf32>
    %66 = arith.select %9, %64, %65 : vector<1x128x128xi1>, vector<1x128x128xf32>
    %cst_31 = arith.constant 2.000000e+00 : f32
    %67 = vector.broadcast %cst_31 : f32 to vector<1x128x128xf32>
    %68 = arith.mulf %67, %56 : vector<1x128x128xf32>
    %69 = arith.addf %66, %68 : vector<1x128x128xf32>
    %c127_i32_32 = arith.constant 127 : i32
    %70 = tpu.dynamic_rotate %56 by %c127_i32_32 dim 1 : vector<1x128x128xf32>, i32 -> vector<1x128x128xf32>
    %cst_33 = arith.constant 0.000000e+00 : f32
    %71 = vector.broadcast %cst_33 : f32 to vector<1x128x128xf32>
    %72 = arith.select %11, %70, %71 : vector<1x128x128xi1>, vector<1x128x128xf32>
    %73 = arith.addf %69, %72 : vector<1x128x128xf32>
    %74 = arith.mulf %73, %73 : vector<1x128x128xf32>
    %75 = arith.mulf %63, %63 : vector<1x128x128xf32>
    %76 = arith.addf %74, %75 : vector<1x128x128xf32>
    %cst_34 = arith.constant 1.000000e-18 : f32
    %77 = vector.broadcast %cst_34 : f32 to vector<1x128x128xf32>
    %78 = arith.addf %76, %77 : vector<1x128x128xf32>
    %79 = math.sqrt %78 : vector<1x128x128xf32>
    %80 = arith.subf %79, %45 : vector<1x128x128xf32>
    %81 = arith.mulf %80, %80 : vector<1x128x128xf32>
    %cst_35 = arith.constant 0.000000e+00 : f32
    %82 = vector.broadcast %cst_35 : f32 to vector<1x128x128xf32>
    %83 = arith.cmpf oeq, %81, %82 : vector<1x128x128xf32>
    %cst_36 = arith.constant 1.000000e-18 : f32
    %84 = vector.broadcast %cst_36 : f32 to vector<1x128x128xf32>
    %85 = arith.addf %81, %84 : vector<1x128x128xf32>
    %86 = math.sqrt %85 : vector<1x128x128xf32>
    %cst_37 = arith.constant 0.000000e+00 : f32
    %87 = vector.broadcast %cst_37 : f32 to vector<1x128x128xf32>
    %88 = arith.select %83, %87, %86 : vector<1x128x128xi1>, vector<1x128x128xf32>
    %cst_38 = arith.constant dense<0.000000e+00> : vector<128xf32>
    %89 = vector.multi_reduction <add>, %88, %cst_38 [0, 1] : vector<1x128x128xf32> to vector<128xf32>
    %90 = vector.shape_cast %89 : vector<128xf32> to vector<1x1x128xf32>
    %c0_39 = arith.constant 0 : index
    %c0_40 = arith.constant 0 : index
    %c0_41 = arith.constant 0 : index
    %91 = vector.load %arg3[%c0_39, %c0_40, %c0_41] : memref<1x1x128xf32, #tpu.memory_space<vmem>>, vector<1x1x128xf32>
    tpu.vector_store %arg3[%c0_39, %c0_40, %c0_41], %90 {strides = array<i32>} : memref<1x1x128xf32, #tpu.memory_space<vmem>>, vector<1x1x128xf32>,
    return
  }
  func.func @transform_0(%arg0: i32) -> (i32, i32, i32) {
    %c0_i32 = arith.constant 0 : i32
    %c0_i32_0 = arith.constant 0 : i32
    %c0_i32_1 = arith.constant 0 : i32
    return %arg0, %c0_i32, %c0_i32_0 : i32, i32, i32
  }
  func.func @transform_1(%arg0: i32) -> (i32, i32, i32) {
    %c0_i32 = arith.constant 0 : i32
    %c0_i32_0 = arith.constant 0 : i32
    %c0_i32_1 = arith.constant 0 : i32
    return %arg0, %c0_i32, %c0_i32_0 : i32, i32, i32
  }
  func.func @transform_2(%arg0: i32) -> (i32, i32, i32) {
    %c0_i32 = arith.constant 0 : i32
    %c0_i32_0 = arith.constant 0 : i32
    %c0_i32_1 = arith.constant 0 : i32
    return %arg0, %c0_i32, %c0_i32_0 : i32, i32, i32
  }
}

</mosaic_0001>

<bundles_post_ra>
// kernel: tpu_custom_call.1
= control target key start
LH: loop header
LB: loop body
LE: loop exit
PB: predicated region body
PF: predicated region fallthrough
CT: control target
= control target key end

     0   :  { %7 = vsyncpa [#allocation3], 0  ;;  %s4351_s0 = inlined_call_operand.hbm [shape: f32[2,128,128], index: 0, kind: input, shape index: {}]   ;;  %s4352_s1 = inlined_call_operand.hbm [shape: f32[2,128,128], index: 1, kind: input, shape index: {}]   ;;  %s4353_s2 = inlined_call_operand.hbm [shape: f32[2,1,128], index: 2, kind: output, shape index: {}]  }
   0x1   :  { %9 = vsyncpa [#allocation3 + $0x1], 0 }
   0x2   :  { %10 = vsyncpa [#allocation6], 0 }
   0x3   :  { %12 = vsyncpa [#allocation6 + $0x1], 0 }
   0x4   :  { %13 = vsyncpa [#allocation4], 0 }
   0x5   :  { %15 = vsyncpa [#allocation4 + $0x1], 0  ;;  %s2116_s9 = smov 0   ;;  %s2118_s10 = smov 0  }
   0x6   :  { %s2120_s11 = smov 0   ;;  %s2122_s12 = smov 0  }
   0x7 LB: > { %s2137_s13 = sadd.s32 4294967295, %s2092_s12   ;;  %s1788_s14 = sadd.s32 4294967294, %s2092_s12   ;;  %s2092_s12 = sphi %s2122_s12, %s4400_s12   ;;  %s2088_s11 = sphi %s2120_s11, %s4399_s11   ;;  %s2084_s10 = sphi %s2118_s10, %s4398_s10   ;;  %s2080_s9 = sphi %s2116_s9, %s4397_s9  }
   0x8   : > { %s2141_s15 = sadd.s32 1, %s2092_s12   ;;  %s28_s16 = sadd.s32 1, %s2088_s11 }
   0x9   : > { %s25_s17 = ssub.s32 %s2092_s12, %s2141_s15  ;;  %p35_p0 = scmp.ne.s32.totalorder %s2088_s11, %s2084_s10 }
   0xa   : > { %p26_p1 = scmp.eq.s32.totalorder %s25_s17, 0  ;;  %p36_p2 = scmp.eq.s32.totalorder %s2092_s12, 0 }
   0xb   : > { %p41_p3 = scmp.ne.s32.totalorder %s2084_s10, %s2080_s9  ;;  %p42_p4 = scmp.eq.s32.totalorder %s2137_s13, 0 }
   0xc   : > { %s2153_s18 = scalar_select %p26_p1, %s2088_s11, %s28_s16  }
   0xd   : > { %p2155_p5 = por %p36_p2, %p35_p0  ;;  %p2159_p6 = por %p42_p4, %p41_p3 }
   0xe   : > { %p91_p7 = scmp.eq.s32.totalorder %s2137_s13, 1  ;;  %p97_p8 = scmp.eq.s32.totalorder %s1788_s14, 1 }
   0xf   : > { %s4371_s20 = scalar_select %p2159_p6, 1, 0 }
  0x10   : > { %p1822_p10 = scmp.lt.s32.totalorder %s2092_s12, 2  ;;  %p2166_p11 = por %p91_p7, %p35_p0 }
  0x11   : > { %p2170_p12 = por %p97_p8, %p41_p3  ;;  %s2175_s23 = sand.u32 1, %s2088_s11  }
  0x12   : > { %s4372_s21 = scalar_select %p2166_p11, 1, 0 }
  0x13   : > { %s4373_s22 = scalar_select %p2170_p12, 1, 0 }
  0x14   : > { %s1803_s24 = sshll.u32 %s2092_s12, 11  ;;  %s1791_s25 = sshll.u32 %s2175_s23, 7 }
  0x15   : > { %s2184_s28 = scalar_lea.hbm %s4351_s0, %s1803_s24  ;;  %s121_s29 = scalar_lea.vmem [#allocation2], %s1791_s25 }
  0x16   : > { %s128_s30 = sshll.u32 %s121_s29, 4  ;;  %p2190_p13 = pnand %p1822_p10, %p2155_p5  ;;  %s2194_s30 = int_to_ptr.vmem [resolvable:$true] %s128_s30 }
  0x17   : > { %s118_s4 = scalar_lea.sflag [#allocation3], %s2175_s23  ;;  %s1968_s5 = scalar_lea.hbm %s2184_s28, 2048 }
  0x18   : > { %p1969_p0 = scmp.ne.s32.totalorder %s2184_s28, %s1968_s5  ;;  %p1970_p1 = pneg %p2190_p13 }
  0x19   : > { %s1973_s8 = scalar_lea.hbm %s4351_s0, 4096  ;;  %p1974_p4 = scmp.lt.s32.totalorder %s2184_s28, %s4351_s0 }
  0x1a   : > { %p1971_p2 = pnand %p1970_p1, %p1969_p0  ;;  %p1975_p5 = scmp.lt.s32.totalorder %s1973_s8, %s1968_s5 }
  0x1c   : > { %p1972_p3 = pneg %p1971_p2  ;;  %p1976_p7 = por %p1975_p5, %p1974_p4 }
  0x1e   : > { %p1977_p8 = pnand %p1976_p7, %p1972_p3 }
  0x20   : > { %1980 = shalt.err (!%p1977_p8)
}
  0x21   : > { %s1981_s17 = scalar_lea.vmem %s2194_s30, 2048  ;;  %s2094_s19 = smov [#allocation2]  }
  0x22   : > { %p1982_p10 = scmp.ne.s32.totalorder %s2194_s30, %s1981_s17  ;;  %s1986_s26 = sshll.u32 %s2094_s19, 4  ;;  %s1987_s26 = int_to_ptr.vmem [resolvable:$false] %s1986_s26 }
  0x23   : > { %s1988_s27 = scalar_lea.vmem %s1987_s26, 4096  ;;  %p1989_p9 = scmp.lt.s32.totalorder %s2194_s30, %s1987_s26 }
  0x24   : > { %p1984_p0 = pnand %p1982_p10, %p1970_p1  ;;  %p1990_p12 = scmp.lt.s32.totalorder %s1988_s27, %s1981_s17 }
  0x26   : > { %p1985_p2 = pneg %p1984_p0  ;;  %p1991_p11 = por %p1990_p12, %p1989_p9 }
  0x28   : > { %p1992_p4 = pnand %p1991_p11, %p1985_p2 }
  0x2a   : > { %1995 = shalt.err (!%p1992_p4)
}
  0x2b   : > { %s2095_s29 = smov 128   ;;  %s2096_s5 = smov 8  }
  0x2c   : > { %1814 = dma.hbm_to_vmem [thread:$0]  (!%p2190_p13), %s2184_s28, 2048, %s2194_s30, %s118_s4, %s2095_s29, %s2095_s29, %s2096_s5  }
  0x2d   : > { %p1797_p9 = scmp.ge.s32.totalorder %s2092_s12, 1  ;;  %p157_p11 = scmp.lt.s32.totalorder %s2092_s12, 3 }
  0x2e   : > { %s2237_s14 = scalar_lea.hbm %s4352_s1, %s1803_s24  ;;  %s142_s16 = scalar_lea.vmem [#allocation5], %s1791_s25 }
  0x2f   : > { %p2228_p12 = pnand %p1797_p9, %p157_p11  ;;  %s149_s17 = sshll.u32 %s142_s16, 4  ;;  %s2241_s17 = int_to_ptr.vmem [resolvable:$true] %s149_s17 }
  0x30   : > { %s139_s28 = scalar_lea.sflag [#allocation6], %s2175_s23  ;;  %s1996_s30 = scalar_lea.hbm %s2237_s14, 2048 }
  0x31   : > { %p1997_p3 = scmp.ne.s32.totalorder %s2237_s14, %s1996_s30  ;;  %s2001_s24 = scalar_lea.hbm %s4352_s1, 4096 }
  0x32   : > { %p2002_p8 = scmp.lt.s32.totalorder %s2237_s14, %s4352_s1  ;;  %p2003_p10 = scmp.lt.s32.totalorder %s2001_s24, %s1996_s30 }
  0x33   : > { %p1999_p5 = pnand %p1997_p3, %p1970_p1 }
  0x34   : > { %p2004_p0 = por %p2003_p10, %p2002_p8 }
  0x35   : > { %p2000_p7 = pneg %p1999_p5 }
  0x37   : > { %p2005_p2 = pnand %p2004_p0, %p2000_p7 }
  0x39   : > { %2008 = shalt.err (!%p2005_p2)
}
  0x3a   : > { %s2009_s23 = scalar_lea.vmem %s2241_s17, 2048  ;;  %s2097_s25 = smov [#allocation5]  }
  0x3b   : > { %p2010_p4 = scmp.ne.s32.totalorder %s2241_s17, %s2009_s23  ;;  %s2014_s7 = sshll.u32 %s2097_s25, 4  ;;  %s2015_s7 = int_to_ptr.vmem [resolvable:$false] %s2014_s7 }
  0x3c   : > { %s2016_s8 = scalar_lea.vmem %s2015_s7, 4096  ;;  %p2017_p3 = scmp.lt.s32.totalorder %s2241_s17, %s2015_s7 }
  0x3d   : > { %p2012_p9 = pnand %p2010_p4, %p1970_p1  ;;  %p2018_p5 = scmp.lt.s32.totalorder %s2016_s8, %s2009_s23 }
  0x3f   : > { %p2013_p11 = pneg %p2012_p9  ;;  %p2019_p6 = por %p2018_p5, %p2017_p3 }
  0x41   : > { %p2020_p8 = pnand %p2019_p6, %p2013_p11 }
  0x43   : > { %2023 = shalt.err (!%p2020_p8)
}
  0x44   : > { %1817 = dma.hbm_to_vmem [thread:$0]  (!%p2190_p13), %s2237_s14, 2048, %s2241_s17, %s139_s28, %s2095_s29, %s2095_s29, %s2096_s5  }
  0x45   : > { %161 = sbr.rel (%p2228_p12) target bundleno = 521 (0x209), region = 28  ;;  %s2272_s16 = sand.u32 (!%p2228_p12), 1, %s2084_s10  }
  0x46   : > { %s1798_s30 = sshll.u32 (!%p2228_p12), %s2272_s16, 7  ;;  %s164_s4 = scalar_lea.sflag (!%p2228_p12), [#allocation3], %s2272_s16 }
  0x47   : > { %s2276_s19 = scalar_lea.vmem (!%p2228_p12), [#allocation2], %s1798_s30  ;;  %p4376_p6 = scmp.ne.s32.totalorder (!%p2228_p12), %s4371_s20, 0 }
  0x4a   : > { %2067 = dma.done.wait (%p4376_p6), %s164_s4, 2048  }
  0x4b   : > { %2069 = vsyncadd (%p4376_p6), %s164_s4, 4294965248  ;;  %s173_s3 = scalar_lea.sflag [#allocation6], %s2272_s16  ;;  %s2283_s29 = scalar_lea.vmem [#allocation5], %s1798_s30 }
  0x4c   : > { %2071 = dma.done.wait (%p4376_p6), %s173_s3, 2048  }
  0x4d   : > { %2073 = vsyncadd (%p4376_p6), %s173_s3, 4294965248  ;;  %v2290_v0 = vld [vmem:[%s2276_s19] sm:$0xff]  ;;  %s2098_s5 = smov 127   ;;  %s2099_s6 = smov 1   ;;  %v2297_v1 = vld [vmem:[%s2276_s19 + $0x78] sm:$0xff]  ;;  %v233_v28 = vlaneseq }
  0x4e   : > { %334 = vrot.lane.b32.xlu1 %v2290_v0, %s2098_s5  ;;  %286 = vrot.lane.b32.xlu0 %v2290_v0, %s2099_s6  ;;  %v2304_v2 = vld [vmem:[%s2283_s29 + $0x78] sm:$0xff]  ;;  %v2307_v3 = vld [vmem:[%s2283_s29] sm:$0xff]  ;;  %v382_v32 = vmul.f32 2.0, %v2290_v0  ;;  %v397_v41 = vmul.f32 2.0, %v2297_v1  ;;  %s1800_s20 = sshll.u32 %s2137_s13, 4  ;;  %s200_s14 = scalar_lea.vmem [#allocation7], %s2272_s16 }
  0x4f   : > { %v2318_v4 = vld [vmem:[%s2276_s19 + $0x10] sm:$0xff]  ;;  %v2321_v5 = vld [vmem:[%s2276_s19 + $0x8] sm:$0xff]  ;;  %v2342_v8 = vld [vmem:[%s2276_s19 + $0x18] sm:$0xff]  ;;  %v2454_v30 = vand.u32 127, %v233_v28  ;;  %v2471_v40 = vshrl.u32 %v233_v28, 7  ;;  %v991_v52 = vmul.f32 2.0, %v2304_v2  ;;  %s1697_s26 = scalar_lea.hbm %s4353_s2, %s1800_s20 }
  0x50   : > { %v2328_v6 = vld [vmem:[%s2283_s29 + $0x8] sm:$0xff]  ;;  %v2335_v7 = vld [vmem:[%s2283_s29 + $0x10] sm:$0xff]  ;;  %v2349_v9 = vld [vmem:[%s2283_s29 + $0x18] sm:$0xff]  ;;  %v976_v53 = vmul.f32 2.0, %v2307_v3  ;;  %s1699_s17 = sshll.u32 %s200_s14, 4  ;;  %s1687_s27 = scalar_lea.sflag [#allocation4], %s2272_s16  ;;  %s1700_s17 = int_to_ptr.vmem [resolvable:$true] %s1699_s17 }
  0x51   : > { %v2356_v10 = vld [vmem:[%s2276_s19 + $0x20] sm:$0xff]  ;;  %v2370_v12 = vld [vmem:[%s2276_s19 + $0x28] sm:$0xff]  ;;  %v2384_v14 = vld [vmem:[%s2276_s19 + $0x30] sm:$0xff]  ;;  %vm253_vm0 = vcmp.lt.s32.totalorder %v2454_v30, 127  ;;  %vm252_vm1 = vcmp.gt.s32.totalorder %v2454_v30, 0  ;;  %vm254_vm2 = vcmp.gt.s32.totalorder %v2471_v40, 0 }
  0x52   : > { %364 = vrot.lane.b32.xlu1 %v2297_v1, %s2098_s5  ;;  %316 = vrot.lane.b32.xlu0 %v2297_v1, %s2099_s6  ;;  %v2363_v11 = vld [vmem:[%s2283_s29 + $0x20] sm:$0xff]  ;;  %v2377_v13 = vld [vmem:[%s2283_s29 + $0x28] sm:$0xff]  ;;  %vm462_vm3 = vcmp.lt.s32.totalorder %v2471_v40, 7  ;;  %vm511_vm4 = vcmp.lt.s32.totalorder %v2471_v40, 1  ;;  %s2024_s23 = scalar_lea.vmem %s1700_s17, 16  ;;  %p4394_p1 = scmp.ne.s32.totalorder %s4372_s21, 0 }
  0x53   : > { %v2391_v15 = vld [vmem:[%s2283_s29 + $0x30] sm:$0xff]  ;;  %v2398_v16 = vld [vmem:[%s2276_s19 + $0x38] sm:$0xff]  ;;  %v2412_v18 = vld [vmem:[%s2276_s19 + $0x40] sm:$0xff]  ;;  %p2025_p13 = scmp.ne.s32.totalorder %s1700_s17, %s2024_s23  ;;  %s2100_s25 = smov [#allocation7]  }
  0x54   : > { %v2405_v17 = vld [vmem:[%s2283_s29 + $0x38] sm:$0xff]  ;;  %v2419_v19 = vld [vmem:[%s2283_s29 + $0x40] sm:$0xff]  ;;  %v210_v20 = vld [vmem:[%s2276_s19 + $0x48] sm:$0xff]  ;;  %s2028_s7 = sshll.u32 %s2100_s25, 4  ;;  %s2029_s7 = int_to_ptr.vmem [resolvable:$false] %s2028_s7 }
  0x55   : > { %v226_v21 = vld [vmem:[%s2283_s29 + $0x48] sm:$0xff]  ;;  %v211_v22 = vld [vmem:[%s2276_s19 + $0x50] sm:$0xff]  ;;  %v212_v24 = vld [vmem:[%s2276_s19 + $0x58] sm:$0xff]  ;;  %p2026_p12 = pnand %p2025_p13, %p4394_p1  ;;  %s2030_s13 = scalar_lea.vmem %s2029_s7, 32 }
  0x56   : > { %910 = vrot.lane.b32.xlu1 %v2304_v2, %s2099_s6  ;;  %880 = vrot.lane.b32.xlu0 %v2307_v3, %s2099_s6  ;;  %v227_v23 = vld [vmem:[%s2283_s29 + $0x50] sm:$0xff]  ;;  %v228_v25 = vld [vmem:[%s2283_s29 + $0x58] sm:$0xff]  ;;  %p2031_p10 = scmp.lt.s32.totalorder %s1700_s17, %s2029_s7  ;;  %p2032_p0 = scmp.lt.s32.totalorder %s2030_s13, %s2024_s23 }
  0x57   : > { %v213_v26 = vld [vmem:[%s2276_s19 + $0x60] sm:$0xff]  ;;  %v214_v29 = vld [vmem:[%s2276_s19 + $0x68] sm:$0xff]  ;;  %v215_v33 = vld [vmem:[%s2276_s19 + $0x70] sm:$0xff]  ;;  %p2027_p7 = pneg %p2026_p12 }
  0x58   : > { %v229_v27 = vld [vmem:[%s2283_s29 + $0x60] sm:$0xff]  ;;  %v230_v31 = vld [vmem:[%s2283_s29 + $0x68] sm:$0xff]  ;;  %v231_v42 = vld [vmem:[%s2283_s29 + $0x70] sm:$0xff]  ;;  %p2033_p2 = por %p2032_p0, %p2031_p10 }
  0x5a   : > { %958 = vrot.lane.b32.xlu1 %v2304_v2, %s2098_s5  ;;  %928 = vrot.lane.b32.xlu0 %v2307_v3, %s2098_s5  ;;  %p2034_p4 = pnand %p2033_p2, %p2027_p7 }
  0x5e   : > { %290 = vrot.lane.b32.xlu1 %v2318_v4, %s2099_s6  ;;  %288 = vrot.lane.b32.xlu0 %v2321_v5, %s2099_s6 }
  0x62   : > { %882 = vrot.lane.b32.xlu1 %v2328_v6, %s2099_s6  ;;  %336 = vrot.lane.b32.xlu0 %v2321_v5, %s2098_s5 }
  0x66   : > { %930 = vrot.lane.b32.xlu1 %v2328_v6, %s2098_s5  ;;  %884 = vrot.lane.b32.xlu0 %v2335_v7, %s2099_s6 }
  0x6a   : > { %338 = vrot.lane.b32.xlu1 %v2318_v4, %s2098_s5  ;;  %292 = vrot.lane.b32.xlu0 %v2342_v8, %s2099_s6 }
  0x6e   : > { %932 = vrot.lane.b32.xlu1 %v2335_v7, %s2098_s5  ;;  %886 = vrot.lane.b32.xlu0 %v2349_v9, %s2099_s6 }
  0x72   : > { %340 = vrot.lane.b32.xlu1 %v2342_v8, %s2098_s5  ;;  %294 = vrot.lane.b32.xlu0 %v2356_v10, %s2099_s6 }
  0x76   : > { %934 = vrot.lane.b32.xlu1 %v2349_v9, %s2098_s5  ;;  %888 = vrot.lane.b32.xlu0 %v2363_v11, %s2099_s6 }
  0x7a   : > { %342 = vrot.lane.b32.xlu1 %v2356_v10, %s2098_s5  ;;  %296 = vrot.lane.b32.xlu0 %v2370_v12, %s2099_s6 }
  0x7e   : > { %936 = vrot.lane.b32.xlu1 %v2363_v11, %s2098_s5  ;;  %890 = vrot.lane.b32.xlu0 %v2377_v13, %s2099_s6 }
  0x82   : > { %344 = vrot.lane.b32.xlu1 %v2370_v12, %s2098_s5  ;;  %298 = vrot.lane.b32.xlu0 %v2384_v14, %s2099_s6 }
  0x86   : > { %938 = vrot.lane.b32.xlu1 %v2377_v13, %s2098_s5  ;;  %892 = vrot.lane.b32.xlu0 %v2391_v15, %s2099_s6 }
  0x8a   : > { %346 = vrot.lane.b32.xlu1 %v2384_v14, %s2098_s5  ;;  %300 = vrot.lane.b32.xlu0 %v2398_v16, %s2099_s6 }
  0x8e   : > { %940 = vrot.lane.b32.xlu1 %v2391_v15, %s2098_s5  ;;  %894 = vrot.lane.b32.xlu0 %v2405_v17, %s2099_s6 }
  0x92   : > { %348 = vrot.lane.b32.xlu1 %v2398_v16, %s2098_s5  ;;  %302 = vrot.lane.b32.xlu0 %v2412_v18, %s2099_s6 }
  0x96   : > { %942 = vrot.lane.b32.xlu1 %v2405_v17, %s2098_s5  ;;  %896 = vrot.lane.b32.xlu0 %v2419_v19, %s2099_s6 }
  0x9a   : > { %350 = vrot.lane.b32.xlu1 %v2412_v18, %s2098_s5  ;;  %304 = vrot.lane.b32.xlu0 %v210_v20, %s2099_s6 }
  0x9e   : > { %944 = vrot.lane.b32.xlu1 %v2419_v19, %s2098_s5  ;;  %898 = vrot.lane.b32.xlu0 %v226_v21, %s2099_s6 }
  0xa2   : > { %352 = vrot.lane.b32.xlu1 %v210_v20, %s2098_s5  ;;  %306 = vrot.lane.b32.xlu0 %v211_v22, %s2099_s6 }
  0xa6   : > { %946 = vrot.lane.b32.xlu1 %v226_v21, %s2098_s5  ;;  %900 = vrot.lane.b32.xlu0 %v227_v23, %s2099_s6 }
  0xaa   : > { %354 = vrot.lane.b32.xlu1 %v211_v22, %s2098_s5  ;;  %308 = vrot.lane.b32.xlu0 %v212_v24, %s2099_s6 }
  0xae   : > { %948 = vrot.lane.b32.xlu1 %v227_v23, %s2098_s5  ;;  %902 = vrot.lane.b32.xlu0 %v228_v25, %s2099_s6 }
  0xb2   : > { %356 = vrot.lane.b32.xlu1 %v212_v24, %s2098_s5  ;;  %310 = vrot.lane.b32.xlu0 %v213_v26, %s2099_s6 }
  0xb6   : > { %950 = vrot.lane.b32.xlu1 %v228_v25, %s2098_s5  ;;  %904 = vrot.lane.b32.xlu0 %v229_v27, %s2099_s6 }
  0xba   : > { %358 = vrot.lane.b32.xlu1 %v213_v26, %s2098_s5  ;;  %312 = vrot.lane.b32.xlu0 %v214_v29, %s2099_s6 }
  0xbe   : > { %952 = vrot.lane.b32.xlu1 %v229_v27, %s2098_s5  ;;  %906 = vrot.lane.b32.xlu0 %v230_v31, %s2099_s6 }
  0xc0   : > { %v335_v34 = vpop.permute.xlu1 %334  ;;  %v287_v35 = vpop.permute.xlu0 %286 }
  0xc1   : > { %v366_v36 = vsel %vm253_vm0, %v335_v34, 0.0  ;;  %v318_v37 = vsel %vm252_vm1, %v287_v35, 0.0  ;;  %v384_v35 = vmul.f32 2.0, %v2318_v4 }
  0xc2   : > { %v398_v38 = vadd.f32 %v382_v32, %v318_v37  ;;  %v2467_v39 = vsub.f32 %v366_v36, %v318_v37  ;;  %360 = vrot.lane.b32.xlu1 %v214_v29, %s2098_s5  ;;  %314 = vrot.lane.b32.xlu0 %v215_v33, %s2099_s6 }
  0xc4   : > { %v2475_v43 = vadd.f32 %v398_v38, %v366_v36  ;;  %v365_v44 = vpop.permute.xlu1 %364  ;;  %v317_v45 = vpop.permute.xlu0 %316  ;;  %v560_v50 = vrot.slane %v2467_v39, 7  ;;  %v608_v51 = vmul.f32 2.0, %v2467_v39  ;;  %v640_v54 = vrot.slane %v2467_v39, 1 }
  0xc5   : > { %v381_v46 = vsel %vm253_vm0, %v365_v44, 0.0  ;;  %v333_v47 = vsel %vm252_vm1, %v317_v45, 0.0  ;;  %v383_v36 = vmul.f32 2.0, %v2321_v5  ;;  %v977_v45 = vmul.f32 2.0, %v2328_v6 }
  0xc6   : > { %v413_v48 = vadd.f32 %v397_v41, %v333_v47  ;;  %v2484_v49 = vsub.f32 %v381_v46, %v333_v47  ;;  %954 = vrot.lane.b32.xlu1 %v230_v31, %s2098_s5  ;;  %908 = vrot.lane.b32.xlu0 %v231_v42, %s2099_s6  ;;  %v446_v60 = vrot.slane %v2475_v43, 1  ;;  %v495_v61 = vrot.slane %v2475_v43, 7 }
  0xc8   : > { %v2493_v55 = vadd.f32 %v413_v48, %v381_v46  ;;  %v4357_v56 = vrot.slane %v2484_v49, 7  ;;  %v4356_v57 = vrot.slane %v2484_v49, 1  ;;  %v911_v58 = vpop.permute.xlu1 %910  ;;  %v881_v59 = vpop.permute.xlu0 %880 }
  0xc9   : > { %v927_v62 = vsel %vm252_vm1, %v911_v58, 0.0  ;;  %v912_v63 = vsel %vm252_vm1, %v881_v59, 0.0 }
  0xca   : > { %v4358_v0 = vrot.slane %v2493_v55, 1  ;;  %v4359_v1 = vrot.slane %v2493_v55, 7  ;;  %v591_v2 = vsel %vm511_vm4, %v4357_v56, %v560_v50  ;;  %v2517_v3 = vsel %vm462_vm3, %v4356_v57, %v640_v54  ;;  %956 = vrot.lane.b32.xlu1 %v231_v42, %s2098_s5  ;;  %362 = vrot.lane.b32.xlu0 %v215_v33, %s2098_s5 }
  0xcb   : > { %v592_v20 = vsel %vm254_vm2, %v591_v2, 0.0  ;;  %v1007_v21 = vadd.f32 %v991_v52, %v927_v62  ;;  %v992_v22 = vadd.f32 %v976_v53, %v912_v63 }
  0xcc   : > { %v2529_v23 = vsel %vm462_vm3, %v4358_v0, %v446_v60  ;;  %v527_v24 = vsel %vm511_vm4, %v4359_v1, %v495_v61  ;;  %v624_v25 = vadd.f32 %v608_v51, %v592_v20  ;;  %v959_v26 = vpop.permute.xlu1 %958  ;;  %v929_v27 = vpop.permute.xlu0 %928 }
  0xcd   : > { %v975_v28 = vsel %vm253_vm0, %v959_v26, 0.0  ;;  %v960_v29 = vsel %vm253_vm0, %v929_v27, 0.0 }
  0xce   : > { %v2541_v31 = vadd.f32 %v1007_v21, %v975_v28  ;;  %v2543_v32 = vsub.f32 %v975_v28, %v927_v62  ;;  %v2545_v33 = vadd.f32 %v992_v22, %v960_v29  ;;  %v2547_v34 = vsub.f32 %v960_v29, %v912_v63 }
  0xd0   : > { %v4361_v37 = vrot.slane %v2541_v31, 1  ;;  %v4360_v38 = vrot.slane %v2541_v31, 7  ;;  %v4363_v41 = vrot.slane %v2543_v32, 7  ;;  %v291_v42 = vpop.permute.xlu1 %290  ;;  %v289_v44 = vpop.permute.xlu0 %288  ;;  %v4362_v46 = vrot.slane %v2543_v32, 1 }
  0xd1   : > { %v1040_v47 = vrot.slane %v2545_v33, 1  ;;  %v1088_v48 = vrot.slane %v2545_v33, 7  ;;  %v1152_v4 = vrot.slane %v2547_v34, 7  ;;  %v1200_v5 = vmul.f32 2.0, %v2547_v34 }
  0xd2   : > { %v1232_v51 = vrot.slane %v2547_v34, 1  ;;  %v320_v52 = vsel %vm252_vm1, %v291_v42, 0.0  ;;  %v319_v53 = vsel %vm252_vm1, %v289_v44, 0.0  ;;  %v978_v44 = vmul.f32 2.0, %v2335_v7 }
  0xd3   : > { %v2569_v6 = vsel %vm462_vm3, %v4361_v37, %v1040_v47  ;;  %v1119_v58 = vsel %vm511_vm4, %v4360_v38, %v1088_v48  ;;  %v1183_v59 = vsel %vm511_vm4, %v4363_v41, %v1152_v4  ;;  %v400_v62 = vadd.f32 %v384_v35, %v320_v52 }
  0xd4   : > { %v1184_v63 = vsel %vm254_vm2, %v1183_v59, 0.0  ;;  %v2585_v2 = vsel %vm462_vm3, %v4362_v46, %v1232_v51  ;;  %v883_v20 = vpop.permute.xlu1 %882  ;;  %v337_v21 = vpop.permute.xlu0 %336  ;;  %v399_v26 = vadd.f32 %v383_v36, %v319_v53  ;;  %v528_v35 = vsel %vm254_vm2, %v527_v24, 0.0 }
  0xd5   : > { %v1216_v22 = vadd.f32 %v1200_v5, %v1184_v63  ;;  %v913_v27 = vsel %vm252_vm1, %v883_v20, 0.0  ;;  %v367_v29 = vsel %vm253_vm0, %v337_v21, 0.0  ;;  %v385_v5 = vmul.f32 2.0, %v2342_v8 }
  0xd6   : > { %v993_v28 = vadd.f32 %v977_v45, %v913_v27  ;;  %v415_v33 = vadd.f32 %v399_v26, %v367_v29  ;;  %v2591_v34 = vsub.f32 %v367_v29, %v319_v53  ;;  %v1120_v21 = vsel %vm254_vm2, %v1119_v58, 0.0 }
  0xd8   : > { %v931_v42 = vpop.permute.xlu1 %930  ;;  %v885_v59 = vpop.permute.xlu0 %884  ;;  %v447_v36 = vrot.slane %v415_v33, 1  ;;  %v496_v63 = vrot.slane %v415_v33, 7  ;;  %v561_v20 = vrot.slane %v2591_v34, 7  ;;  %v609_v45 = vmul.f32 2.0, %v2591_v34 }
  0xd9   : > { %v641_v53 = vrot.slane %v2591_v34, 1  ;;  %v961_v24 = vsel %vm253_vm0, %v931_v42, 0.0  ;;  %v914_v7 = vsel %vm252_vm1, %v885_v59, 0.0 }
  0xda   : > { %v477_v8 = vsel %vm462_vm3, %v446_v60, %v447_v36  ;;  %v526_v26 = vsel %vm511_vm4, %v495_v61, %v496_v63  ;;  %v590_v58 = vsel %vm511_vm4, %v560_v50, %v561_v20  ;;  %v2618_v29 = vadd.f32 %v993_v28, %v961_v24 }
  0xdb   : > { %v544_v33 = vsub.f32 %v477_v8, %v528_v35  ;;  %v625_v34 = vadd.f32 %v609_v45, %v590_v58  ;;  %v670_v42 = vsel %vm462_vm3, %v640_v54, %v641_v53  ;;  %v2624_v60 = vsub.f32 %v961_v24, %v913_v27 }
  0xdc   : > { %v339_v43 = vpop.permute.xlu1 %338  ;;  %v688_v59 = vadd.f32 %v670_v42, %v624_v25  ;;  %v1041_v61 = vrot.slane %v2618_v29, 1  ;;  %v1089_v57 = vrot.slane %v2618_v29, 7  ;;  %v994_v56 = vadd.f32 %v978_v44, %v914_v7  ;;  %v293_v39 = vpop.permute.xlu0 %292 }
  0xdd   : > { %v720_v0 = vmul.f32 %v544_v33, %v544_v33  ;;  %v1153_v50 = vrot.slane %v2624_v60, 7  ;;  %v1201_v28 = vmul.f32 2.0, %v2624_v60  ;;  %v1233_v35 = vrot.slane %v2624_v60, 1 }
  0xde   : > { %v704_v45 = vmul.f32 %v688_v59, %v688_v59  ;;  %v1070_v54 = vsel %vm462_vm3, %v1040_v47, %v1041_v61  ;;  %v1118_v25 = vsel %vm511_vm4, %v1088_v48, %v1089_v57  ;;  %v368_v27 = vsel %vm253_vm0, %v339_v43, 0.0 }
  0xdf   : > { %v1136_v44 = vsub.f32 %v1070_v54, %v1120_v21  ;;  %v1182_v24 = vsel %vm511_vm4, %v1152_v4, %v1153_v50  ;;  %v1262_v8 = vsel %vm462_vm3, %v1232_v51, %v1233_v35  ;;  %v2649_v47 = vadd.f32 %v400_v62, %v368_v27 }
  0xe0   : > { %v933_v58 = vpop.permute.xlu1 %932  ;;  %v736_v33 = vadd.f32 %v720_v0, %v704_v45  ;;  %v1217_v42 = vadd.f32 %v1201_v28, %v1182_v24  ;;  %v1280_v48 = vadd.f32 %v1262_v8, %v1216_v22  ;;  %v2651_v59 = vsub.f32 %v368_v27, %v320_v52  ;;  %v887_v45 = vpop.permute.xlu0 %886 }
  0xe1   : > { %v1312_v43 = vmul.f32 %v1136_v44, %v1136_v44  ;;  %v448_v21 = vrot.slane %v2649_v47, 1  ;;  %v497_v54 = vrot.slane %v2649_v47, 7  ;;  %v321_v4 = vsel %vm252_vm1, %v293_v39, 0.0 }
  0xe2   : > { %v2657_v1 = vadd.f32 1e-18, %v736_v33  ;;  %v1296_v38 = vmul.f32 %v1280_v48, %v1280_v48  ;;  %v562_v51 = vrot.slane %v2651_v59, 7  ;;  %v610_v62 = vmul.f32 2.0, %v2651_v59 }
  0xe3   : > { %v476_v0 = vsel %vm462_vm3, %v447_v36, %v448_v21  ;;  %v525_v52 = vsel %vm511_vm4, %v496_v63, %v497_v54  ;;  %v642_v22 = vrot.slane %v2651_v59, 1  ;;  %v401_v28 = vadd.f32 %v385_v5, %v321_v4 }
  0xe4   : > { %1860 = vrsqrt.f32 %v2657_v1  ;;  %v979_v39 = vmul.f32 2.0, %v2349_v9  ;;  %v1328_v27 = vadd.f32 %v1312_v43, %v1296_v38  ;;  %v545_v44 = vsub.f32 %v476_v0, %v526_v26  ;;  %v341_v8 = vpop.permute.xlu1 %340 }
  0xe5   : > { %v589_v36 = vsel %vm511_vm4, %v561_v20, %v562_v51  ;;  %v669_v24 = vsel %vm462_vm3, %v641_v53, %v642_v22  ;;  %v962_v5 = vsel %vm253_vm0, %v933_v58, 0.0  ;;  %v915_v48 = vsel %vm252_vm1, %v887_v45, 0.0 }
  0xe6   : > { %v626_v63 = vadd.f32 %v610_v62, %v589_v36  ;;  %v689_v33 = vadd.f32 %v669_v24, %v625_v34  ;;  %v2680_v9 = vadd.f32 1e-18, %v1328_v27  ;;  %v721_v38 = vmul.f32 %v545_v44, %v545_v44  ;;  %v295_v36 = vpop.permute.xlu0 %294 }
  0xe7   : > { %v2682_v26 = vadd.f32 %v994_v56, %v962_v5  ;;  %v2684_v43 = vsub.f32 %v962_v5, %v914_v7  ;;  %v995_v0 = vadd.f32 %v979_v39, %v915_v48  ;;  %v369_v53 = vsel %vm253_vm0, %v341_v8, 0.0 }
  0xe8   : > { %v705_v20 = vmul.f32 %v689_v33, %v689_v33  ;;  %1862 = vrsqrt.f32 %v2680_v9  ;;  %v386_v34 = vmul.f32 2.0, %v2356_v10  ;;  %v2695_v44 = vadd.f32 %v401_v28, %v369_v53  ;;  %v935_v5 = vpop.permute.xlu1 %934 }
  0xe9   : > { %v1042_v62 = vrot.slane %v2682_v26, 1  ;;  %v1090_v45 = vrot.slane %v2682_v26, 7  ;;  %v1154_v27 = vrot.slane %v2684_v43, 7  ;;  %v1202_v56 = vmul.f32 2.0, %v2684_v43 }
  0xea   : > { %v737_v58 = vadd.f32 %v721_v38, %v705_v20  ;;  %v1234_v7 = vrot.slane %v2684_v43, 1  ;;  %v2697_v39 = vsub.f32 %v369_v53, %v321_v4  ;;  %v449_v29 = vrot.slane %v2695_v44, 1 }
  0xeb   : > { %v1069_v10 = vsel %vm462_vm3, %v1041_v61, %v1042_v62  ;;  %v1117_v28 = vsel %vm511_vm4, %v1089_v57, %v1090_v45  ;;  %v1181_v4 = vsel %vm511_vm4, %v1153_v50, %v1154_v27  ;;  %vm770_vm5 = vcmp.eq.f32.partialorder %v2657_v1, inf }
  0xec   : > { %v2699_v24 = vadd.f32 1e-18, %v737_v58  ;;  %v1137_v8 = vsub.f32 %v1069_v10, %v1118_v25  ;;  %v1218_v33 = vadd.f32 %v1202_v56, %v1181_v4  ;;  %v1261_v61 = vsel %vm462_vm3, %v1233_v35, %v1234_v7 }
  0xed   : > { %v322_v57 = vsel %vm252_vm1, %v295_v36, 0.0  ;;  %vm772_vm6 = vcmp.eq.f32.partialorder %v2657_v1, 0.0  ;;  %v1281_v50 = vadd.f32 %v1261_v61, %v1217_v42  ;;  %v475_v60 = vsel %vm462_vm3, %v448_v21, %v449_v29 }
  0xee   : > { %1864 = vrsqrt.f32 %v2699_v24  ;;  %v1313_v25 = vmul.f32 %v1137_v8, %v1137_v8  ;;  %v498_v35 = vrot.slane %v2695_v44, 7  ;;  %v546_v38 = vsub.f32 %v475_v60, %v525_v52  ;;  %v343_v60 = vpop.permute.xlu1 %342 }
  0xef   : > { %v563_v20 = vrot.slane %v2697_v39, 7  ;;  %v611_v53 = vmul.f32 2.0, %v2697_v39  ;;  %v643_v58 = vrot.slane %v2697_v39, 1  ;;  %v1297_v36 = vmul.f32 %v1281_v50, %v1281_v50 }
  0xf0   : > { %v2745_v42 = vsel %vm511_vm4, %v497_v54, %v498_v35  ;;  %v402_v21 = vadd.f32 %v386_v34, %v322_v57  ;;  %v963_v52 = vsel %vm253_vm0, %v935_v5, 0.0  ;;  %v773_v4 = vand.u32 2147483648, %v2657_v1 }
  0xf1   : > { %v1861_v56 = vpop.eup %1860  ;;  %v588_v8 = vsel %vm511_vm4, %v562_v51, %v563_v20  ;;  %v668_v47 = vsel %vm462_vm3, %v642_v22, %v643_v58  ;;  %v1329_v54 = vadd.f32 %v1313_v25, %v1297_v36  ;;  %v2763_v5 = vadd.f32 %v995_v0, %v963_v52 }
  0xf2   : > { %v769_v10 = vmul.f32 %v1861_v56, %v2657_v1  ;;  %v2761_v34 = vadd.f32 %v611_v53, %v588_v8  ;;  %v690_v61 = vadd.f32 %v668_v47, %v626_v63  ;;  %vm1362_vm7 = vcmp.eq.f32.partialorder %v2680_v9, inf }
  0xf3   : > { %vm1364_vm8 = vcmp.eq.f32.partialorder %v2680_v9, 0.0  ;;  %v722_v50 = vmul.f32 %v546_v38, %v546_v38  ;;  %v2767_v59 = vsub.f32 %v963_v52, %v915_v48  ;;  %v2772_v56 = vadd.f32 1e-18, %v1329_v54 }
  0xf4   : > { %v771_v51 = vsel %vm770_vm5, %v2657_v1, %v769_v10  ;;  %v706_v22 = vmul.f32 %v690_v61, %v690_v61  ;;  %v1043_v25 = vrot.slane %v2763_v5, 1  ;;  %v1091_v0 = vrot.slane %v2763_v5, 7 }
  0xf5   : > { %v1863_v63 = vpop.eup %1862  ;;  %v1155_v53 = vrot.slane %v2767_v59, 7  ;;  %v1203_v36 = vmul.f32 2.0, %v2767_v59  ;;  %v1235_v48 = vrot.slane %v2767_v59, 1  ;;  %v1365_v52 = vand.u32 2147483648, %v2680_v9 }
  0xf6   : > { %v1361_v38 = vmul.f32 %v1863_v63, %v2680_v9  ;;  %1866 = vrsqrt.f32 %v2772_v56  ;;  %v370_v10 = vsel %vm253_vm0, %v343_v60, 0.0  ;;  %v774_v8 = vsel %vm772_vm6, %v773_v4, %v771_v51  ;;  %v889_v60 = vpop.permute.xlu0 %888 }
  0xf7   : > { %v738_v47 = vadd.f32 %v722_v50, %v706_v22  ;;  %v1068_v54 = vsel %vm462_vm3, %v1042_v62, %v1043_v25  ;;  %v2798_v61 = vsel %vm511_vm4, %v1090_v45, %v1091_v0  ;;  %v1180_v62 = vsel %vm511_vm4, %v1154_v27, %v1155_v53 }
  0xf8   : > { %v1363_v1 = vsel %vm1362_vm7, %v2680_v9, %v1361_v38  ;;  %v1138_v4 = vsub.f32 %v1068_v54, %v1117_v28  ;;  %v1260_v26 = vsel %vm462_vm3, %v1234_v7, %v1235_v48  ;;  %v2819_v28 = vadd.f32 %v1203_v36, %v1180_v62  ;;  %v937_v7 = vpop.permute.xlu1 %936 }
  0xf9   : > { %v1366_v45 = vsel %vm1364_vm8, %v1365_v52, %v1363_v1  ;;  %v2817_v50 = vadd.f32 1e-18, %v738_v47  ;;  %v1282_v51 = vadd.f32 %v1260_v26, %v1218_v33  ;;  %v2821_v54 = vadd.f32 %v402_v21, %v370_v10 }
  0xfa   : > { %v1472_v63 = vsub.f32 %v1366_v45, %v774_v8  ;;  %v1314_v38 = vmul.f32 %v1138_v4, %v1138_v4  ;;  %v2826_v37 = vsub.f32 %v370_v10, %v322_v57  ;;  %v980_v9 = vmul.f32 2.0, %v2363_v11  ;;  %v297_v8 = vpop.permute.xlu0 %296 }
  0xfb   : > { %v1865_v22 = vpop.eup %1864  ;;  %1868 = vrsqrt.f32 %v2817_v50  ;;  %v1298_v43 = vmul.f32 %v1282_v51, %v1282_v51  ;;  %v450_v52 = vrot.slane %v2821_v54, 1  ;;  %v499_v36 = vrot.slane %v2821_v54, 7 }
  0xfc   : > { %v2823_v27 = vmul.f32 %v1472_v63, %v1472_v63  ;;  %v387_v33 = vmul.f32 2.0, %v2370_v12  ;;  %v776_v47 = vmul.f32 %v1865_v22, %v2699_v24  ;;  %v916_v57 = vsel %vm252_vm1, %v889_v60, 0.0  ;;  %v345_v63 = vpop.permute.xlu1 %344 }
  0xfd   : > { %v1330_v1 = vadd.f32 %v1314_v38, %v1298_v43  ;;  %v474_v11 = vsel %vm462_vm3, %v449_v29, %v450_v52  ;;  %v2850_v12 = vsel %vm511_vm4, %v498_v35, %v499_v36  ;;  %v564_v10 = vrot.slane %v2826_v37, 7 }
  0xfe   : > { %v2833_v21 = vadd.f32 1e-18, %v2823_v27  ;;  %v612_v4 = vmul.f32 2.0, %v2826_v37  ;;  %vm777_vm9 = vcmp.eq.f32.partialorder %v2699_v24, inf  ;;  %vm779_vm10 = vcmp.eq.f32.partialorder %v2699_v24, 0.0 }
  0xff   : > { %v323_v29 = vsel %vm252_vm1, %v297_v8, 0.0  ;;  %v2859_v60 = vadd.f32 1e-18, %v1330_v1  ;;  %v547_v44 = vsub.f32 %v474_v11, %v2745_v42  ;;  %v587_v35 = vsel %vm511_vm4, %v563_v20, %v564_v10 }
 0x100   : > { %1870 = vrsqrt.f32 %v2833_v21  ;;  %v644_v62 = vrot.slane %v2826_v37, 1  ;;  %v780_v26 = vand.u32 2147483648, %v2699_v24  ;;  %v996_v45 = vadd.f32 %v980_v9, %v916_v57 }
 0x101   : > { %v2870_v51 = vadd.f32 %v612_v4, %v587_v35  ;;  %v964_v22 = vsel %vm253_vm0, %v937_v7, 0.0  ;;  %v778_v42 = vsel %vm777_vm9, %v2699_v24, %v776_v47  ;;  %vm1369_vm11 = vcmp.eq.f32.partialorder %v2772_v56, inf }
 0x102   : > { %v1372_v43 = vand.u32 2147483648, %v2772_v56  ;;  %1872 = vrsqrt.f32 %v2859_v60  ;;  %v667_v9 = vsel %vm462_vm3, %v643_v58, %v644_v62  ;;  %v403_v7 = vadd.f32 %v387_v33, %v323_v29 }
 0x103   : > { %v1867_v38 = vpop.eup %1866  ;;  %v2885_v8 = vadd.f32 %v996_v45, %v964_v22  ;;  %v691_v47 = vadd.f32 %v667_v9, %v2761_v34  ;;  %v723_v1 = vmul.f32 %v547_v44, %v547_v44  ;;  %v2888_v11 = vsub.f32 %v964_v22, %v916_v57  ;;  %v891_v9 = vpop.permute.xlu0 %890 }
 0x104   : > { %v1368_v20 = vmul.f32 %v1867_v38, %v2772_v56  ;;  %v371_v4 = vsel %vm253_vm0, %v345_v63, 0.0  ;;  %vm1371_vm12 = vcmp.eq.f32.partialorder %v2772_v56, 0.0  ;;  %v781_v58 = vsel %vm779_vm10, %v780_v26, %v778_v42 }
 0x105   : > { %v1044_v39 = vrot.slane %v2885_v8, 1  ;;  %v1092_v38 = vrot.slane %v2885_v8, 7  ;;  %v707_v45 = vmul.f32 %v691_v47, %v691_v47  ;;  %v2898_v34 = vadd.f32 %v403_v7, %v371_v4 }
 0x106   : > { %v1370_v35 = vsel %vm1369_vm11, %v2772_v56, %v1368_v20  ;;  %v1236_v56 = vrot.slane %v2888_v11, 1  ;;  %v981_v5 = vmul.f32 2.0, %v2377_v13  ;;  %v2935_v7 = vmul.f32 2.0, %v2398_v16 }
 0x107   : > { %v1373_v33 = vsel %vm1371_vm12, %v1372_v43, %v1370_v35  ;;  %v1067_v44 = vsel %vm462_vm3, %v1043_v25, %v1044_v39  ;;  %v2912_v24 = vsel %vm511_vm4, %v1091_v0, %v1092_v38  ;;  %v739_v22 = vadd.f32 %v723_v1, %v707_v45 }
 0x108   : > { %v1473_v57 = vsub.f32 %v1373_v33, %v781_v58  ;;  %v1869_v26 = vpop.eup %1868  ;;  %v1139_v63 = vsub.f32 %v1067_v44, %v2798_v61  ;;  %v1259_v25 = vsel %vm462_vm3, %v1235_v48, %v1236_v56  ;;  %v2926_v0 = vmul.f32 2.0, %v2384_v14 }
 0x109   : > { %v2928_v43 = vadd.f32 1e-18, %v739_v22  ;;  %v1283_v20 = vadd.f32 %v1259_v25, %v2819_v28  ;;  %v2932_v61 = vmul.f32 2.0, %v2391_v15  ;;  %v783_v48 = vmul.f32 %v1869_v26, %v2817_v50  ;;  %v939_v25 = vpop.permute.xlu1 %938 }
 0x10a   : > { %v2916_v42 = vmul.f32 %v1473_v57, %v1473_v57  ;;  %vm784_vm13 = vcmp.eq.f32.partialorder %v2817_v50, inf  ;;  %v451_v13 = vrot.slane %v2898_v34, 1  ;;  %vm786_vm14 = vcmp.eq.f32.partialorder %v2817_v50, 0.0 }
 0x10b   : > { %v787_v28 = vand.u32 2147483648, %v2817_v50  ;;  %1874 = vrsqrt.f32 %v2928_v43  ;;  %v1315_v15 = vmul.f32 %v1139_v63, %v1139_v63  ;;  %vm1538_vm15 = vcmp.eq.f32.partialorder %v2833_v21, inf }
 0x10c   : > { %v2938_v47 = vadd.f32 1e-18, %v2916_v42  ;;  %v917_v16 = vsel %vm252_vm1, %v891_v9, 0.0  ;;  %v2950_v1 = vsub.f32 %v371_v4, %v323_v29  ;;  %v1156_v35 = vrot.slane %v2888_v11, 7 }
 0x10d   : > { %v1871_v14 = vpop.eup %1870  ;;  %v1299_v58 = vmul.f32 %v1283_v20, %v1283_v20  ;;  %v473_v33 = vsel %vm462_vm3, %v450_v52, %v451_v13  ;;  %v500_v45 = vrot.slane %v2898_v34, 7  ;;  %vm1540_vm2 = vcmp.eq.f32.partialorder %v2833_v21, 0.0 }
 0x10e   : > { %1876 = vrsqrt.f32 %v2938_v47  ;;  %v1541_v44 = vand.u32 2147483648, %v2833_v21  ;;  %v785_v29 = vsel %vm784_vm13, %v2817_v50, %v783_v48  ;;  %vm1376_vm5 = vcmp.eq.f32.partialorder %v2859_v60, inf }
 0x10f   : > { %v1873_v57 = vpop.eup %1872  ;;  %v548_v4 = vsub.f32 %v473_v33, %v2850_v12  ;;  %v1537_v26 = vmul.f32 %v1871_v14, %v2833_v21  ;;  %v1331_v52 = vadd.f32 %v1315_v15, %v1299_v58  ;;  %v2975_v63 = vsel %vm511_vm4, %v499_v36, %v500_v45 }
 0x110   : > { %v1375_v22 = vmul.f32 %v1873_v57, %v2859_v60  ;;  %vm1378_vm6 = vcmp.eq.f32.partialorder %v2859_v60, 0.0  ;;  %v1379_v20 = vand.u32 2147483648, %v2859_v60  ;;  %v997_v9 = vadd.f32 %v981_v5, %v917_v16 }
 0x111   : > { %v645_v12 = vrot.slane %v2950_v1, 1  ;;  %v1179_v54 = vsel %vm511_vm4, %v1155_v53, %v1156_v35  ;;  %v1204_v36 = vmul.f32 2.0, %v2888_v11  ;;  %v2988_v14 = vadd.f32 1e-18, %v1331_v52 }
 0x112   : > { %v1377_v48 = vsel %vm1376_vm5, %v2859_v60, %v1375_v22  ;;  %vm1504_vm7 = vcmp.eq.f32.partialorder %v2823_v27, 0.0  ;;  %v788_v5 = vsel %vm786_vm14, %v787_v28, %v785_v29  ;;  %v965_v53 = vsel %vm253_vm0, %v939_v25, 0.0  ;;  %v299_v28 = vpop.permute.xlu0 %298  ;;  %v347_v25 = vpop.permute.xlu1 %346 }
 0x113   : > { %v1380_v15 = vsel %vm1378_vm6, %v1379_v20, %v1377_v48  ;;  %v666_v59 = vsel %vm462_vm3, %v644_v62, %v645_v12  ;;  %v1539_v60 = vsel %vm1538_vm15, %v2833_v21, %v1537_v26  ;;  %1878 = vrsqrt.f32 %v2988_v14 }
 0x114   : > { %v1474_v58 = vsub.f32 %v1380_v15, %v788_v5  ;;  %v565_v50 = vrot.slane %v2950_v1, 7  ;;  %v692_v33 = vadd.f32 %v666_v59, %v2870_v51  ;;  %v724_v57 = vmul.f32 %v548_v4, %v548_v4 }
 0x115   : > { %v3007_v29 = vadd.f32 %v997_v9, %v965_v53  ;;  %v3009_v22 = vsub.f32 %v965_v53, %v917_v16  ;;  %vm1505_vm8 = vcmp.eq.f32.partialorder %v2916_v42, 0.0  ;;  %v1220_v52 = vadd.f32 %v1204_v36, %v1179_v54 }
 0x116   : > { %v3012_v62 = vmul.f32 %v1474_v58, %v1474_v58  ;;  %v613_v26 = vmul.f32 2.0, %v2950_v1  ;;  %v708_v20 = vmul.f32 %v692_v33, %v692_v33  ;;  %v324_v48 = vsel %vm252_vm1, %v299_v28, 0.0  ;;  %v893_v53 = vpop.permute.xlu0 %892 }
 0x117   : > { %v1045_v5 = vrot.slane %v3007_v29, 1  ;;  %v1093_v51 = vrot.slane %v3007_v29, 7  ;;  %v1542_v16 = vsel %vm1540_vm2, %v1541_v44, %v1539_v60  ;;  %vm791_vm9 = vcmp.eq.f32.partialorder %v2928_v43, inf }
 0x118   : > { %v3022_v4 = vadd.f32 1e-18, %v3012_v62  ;;  %v586_v9 = vsel %vm511_vm4, %v564_v10, %v565_v50  ;;  %v1237_v54 = vrot.slane %v3009_v22, 1  ;;  %v1875_v36 = vpop.eup %1874  ;;  %v740_v15 = vadd.f32 %v724_v57, %v708_v20 }
 0x119   : > { %v1066_v21 = vsel %vm462_vm3, %v1044_v39, %v1045_v5  ;;  %v3044_v37 = vsel %vm511_vm4, %v1092_v38, %v1093_v51  ;;  %v372_v10 = vsel %vm253_vm0, %v347_v25, 0.0  ;;  %vm1545_vm10 = vcmp.eq.f32.partialorder %v2938_v47, inf }
 0x11a   : > { %1880 = vrsqrt.f32 %v3022_v4  ;;  %v794_v59 = vand.u32 2147483648, %v2928_v43  ;;  %v404_v39 = vadd.f32 %v2926_v0, %v324_v48  ;;  %vm1547_vm11 = vcmp.eq.f32.partialorder %v2938_v47, 0.0 }
 0x11b   : > { %v1877_v44 = vpop.eup %1876  ;;  %v1548_v8 = vand.u32 2147483648, %v2938_v47  ;;  %v1140_v38 = vsub.f32 %v1066_v21, %v2912_v24  ;;  %v1648_v58 = vsel %vm1504_vm7, 0.0, %v1542_v16  ;;  %vm793_vm12 = vcmp.eq.f32.partialorder %v2928_v43, 0.0 }
 0x11c   : > { %v1544_v60 = vmul.f32 %v1877_v44, %v2938_v47  ;;  %v629_v28 = vadd.f32 %v613_v26, %v586_v9  ;;  %v1258_v0 = vsel %vm462_vm3, %v1236_v56, %v1237_v54  ;;  %v3065_v33 = vadd.f32 %v404_v39, %v372_v10 }
 0x11d   : > { %v790_v25 = vmul.f32 %v1875_v36, %v2928_v43  ;;  %v3069_v24 = vadd.f32 1e-18, %v740_v15  ;;  %v918_v27 = vsel %vm252_vm1, %v893_v53, 0.0  ;;  %vm1383_vm13 = vcmp.eq.f32.partialorder %v2988_v14, inf  ;;  %v941_v36 = vpop.permute.xlu1 %940  ;;  %v301_v53 = vpop.permute.xlu0 %300 }
 0x11e   : > { %v1546_v57 = vsel %vm1545_vm10, %v2938_v47, %v1544_v60  ;;  %vm1385_vm14 = vcmp.eq.f32.partialorder %v2988_v14, 0.0  ;;  %v1386_v26 = vand.u32 2147483648, %v2988_v14  ;;  %v1284_v16 = vadd.f32 %v1258_v0, %v1220_v52 }
 0x11f   : > { %v1549_v20 = vsel %vm1547_vm11, %v1548_v8, %v1546_v57  ;;  %v1316_v9 = vmul.f32 %v1140_v38, %v1140_v38  ;;  %v3078_v47 = vsub.f32 %v372_v10, %v324_v48  ;;  %v998_v21 = vadd.f32 %v2932_v61, %v918_v27 }
 0x120   : > { %v1649_v56 = vsel %vm1505_vm8, 0.0, %v1549_v20  ;;  %v452_v44 = vrot.slane %v3065_v33, 1  ;;  %v501_v39 = vrot.slane %v3065_v33, 7  ;;  %v1879_v60 = vpop.eup %1878  ;;  %v792_v8 = vsel %vm791_vm9, %v2928_v43, %v790_v25 }
 0x121   : > { %v1664_v15 = vadd.f32 %v1649_v56, %v1648_v58  ;;  %1882 = vrsqrt.f32 %v3069_v24  ;;  %v1300_v42 = vmul.f32 %v1284_v16, %v1284_v16  ;;  %v646_v52 = vrot.slane %v3078_v47, 1 }
 0x122   : > { %v1382_v48 = vmul.f32 %v1879_v60, %v2988_v14  ;;  %v472_v61 = vsel %vm462_vm3, %v451_v13, %v452_v44  ;;  %v3101_v10 = vsel %vm511_vm4, %v500_v45, %v501_v39  ;;  %v966_v38 = vsel %vm253_vm0, %v941_v36, 0.0 }
 0x123   : > { %v1332_v58 = vadd.f32 %v1316_v9, %v1300_v42  ;;  %v549_v0 = vsub.f32 %v472_v61, %v2975_v63  ;;  %v665_v13 = vsel %vm462_vm3, %v645_v12, %v646_v52  ;;  %v325_v34 = vsel %vm252_vm1, %v301_v53, 0.0 }
 0x124   : > { %v1384_v45 = vsel %vm1383_vm13, %v2988_v14, %v1382_v48  ;;  %v1157_v57 = vrot.slane %v3009_v22, 7  ;;  %v693_v25 = vadd.f32 %v665_v13, %v629_v28  ;;  %v3118_v20 = vadd.f32 %v998_v21, %v966_v38 }
 0x125   : > { %v795_v63 = vsel %vm793_vm12, %v794_v59, %v792_v8  ;;  %v1387_v56 = vsel %vm1385_vm14, %v1386_v26, %v1384_v45  ;;  %v3124_v16 = vadd.f32 1e-18, %v1332_v58  ;;  %v725_v12 = vmul.f32 %v549_v0, %v549_v0  ;;  %v349_v8 = vpop.permute.xlu1 %348  ;;  %v895_v45 = vpop.permute.xlu0 %894 }
 0x126   : > { %v1475_v9 = vsub.f32 %v1387_v56, %v795_v63  ;;  %v709_v36 = vmul.f32 %v693_v25, %v693_v25  ;;  %v1046_v53 = vrot.slane %v3118_v20, 1  ;;  %v1094_v60 = vrot.slane %v3118_v20, 7 }
 0x127   : > { %v1881_v42 = vpop.eup %1880  ;;  %vm1506_vm15 = vcmp.eq.f32.partialorder %v3012_v62, 0.0  ;;  %v1205_v28 = vmul.f32 2.0, %v3009_v22  ;;  %1884 = vrsqrt.f32 %v3124_v16  ;;  %v3131_v43 = vsub.f32 %v966_v38, %v918_v27 }
 0x128   : > { %v1551_v14 = vmul.f32 %v1881_v42, %v3022_v4  ;;  %v3134_v59 = vmul.f32 %v1475_v9, %v1475_v9  ;;  %v741_v26 = vadd.f32 %v725_v12, %v709_v36  ;;  %v1065_v21 = vsel %vm462_vm3, %v1045_v5, %v1046_v53 }
 0x129   : > { %vm1552_vm2 = vcmp.eq.f32.partialorder %v3022_v4, inf  ;;  %v1555_v48 = vand.u32 2147483648, %v3022_v4  ;;  %v3150_v27 = vsel %vm511_vm4, %v1093_v51, %v1094_v60  ;;  %v1141_v61 = vsub.f32 %v1065_v21, %v3044_v37 }
 0x12a   : > { %v1553_v38 = vsel %vm1552_vm2, %v3022_v4, %v1551_v14  ;;  %vm1554_vm5 = vcmp.eq.f32.partialorder %v3022_v4, 0.0  ;;  %v3156_v5 = vadd.f32 1e-18, %v3134_v59  ;;  %v1178_v29 = vsel %vm511_vm4, %v1156_v35, %v1157_v57 }
 0x12b   : > { %v1556_v58 = vsel %vm1554_vm5, %v1555_v48, %v1553_v38  ;;  %v566_v51 = vrot.slane %v3078_v47, 7  ;;  %v3165_v0 = vadd.f32 1e-18, %v741_v26  ;;  %v1238_v37 = vrot.slane %v3131_v43, 1 }
 0x12c   : > { %v1650_v4 = vsel %vm1506_vm15, 0.0, %v1556_v58  ;;  %1886 = vrsqrt.f32 %v3156_v5  ;;  %v983_v13 = vmul.f32 2.0, %v2405_v17  ;;  %v1221_v11 = vadd.f32 %v1205_v28, %v1178_v29  ;;  %v943_v17 = vpop.permute.xlu1 %942 }
 0x12d   : > { %v3172_v25 = vadd.f32 %v1664_v15, %v1650_v4  ;;  %v3175_v35 = vmul.f32 2.0, %v2412_v18  ;;  %v3178_v63 = vmul.f32 2.0, %v2419_v19  ;;  %vm798_vm6 = vcmp.eq.f32.partialorder %v3069_v24, inf }
 0x12e   : > { %v1883_v56 = vpop.eup %1882  ;;  %v801_v62 = vand.u32 2147483648, %v3069_v24  ;;  %v614_v12 = vmul.f32 2.0, %v3078_v47  ;;  %v405_v9 = vadd.f32 %v2935_v7, %v325_v34  ;;  %vm800_vm7 = vcmp.eq.f32.partialorder %v3069_v24, 0.0 }
 0x12f   : > { %v585_v18 = vsel %vm511_vm4, %v565_v50, %v566_v51  ;;  %1888 = vrsqrt.f32 %v3165_v0  ;;  %v1257_v19 = vsel %vm462_vm3, %v1237_v54, %v1238_v37  ;;  %v919_v7 = vsel %vm252_vm1, %v895_v45, 0.0 }
 0x130   : > { %v1285_v15 = vadd.f32 %v1257_v19, %v1221_v11  ;;  %v1317_v36 = vmul.f32 %v1141_v61, %v1141_v61  ;;  %v999_v42 = vadd.f32 %v983_v13, %v919_v7  ;;  %v373_v1 = vsel %vm253_vm0, %v349_v8, 0.0 }
 0x131   : > { %v797_v50 = vmul.f32 %v1883_v56, %v3069_v24  ;;  %v3203_v28 = vadd.f32 %v405_v9, %v373_v1  ;;  %v3205_v14 = vsub.f32 %v373_v1, %v325_v34  ;;  %v967_v26 = vsel %vm253_vm0, %v943_v17, 0.0 }
 0x132   : > { %vm1390_vm8 = vcmp.eq.f32.partialorder %v3124_v16, inf  ;;  %v630_v54 = vadd.f32 %v614_v12, %v585_v18  ;;  %v1301_v21 = vmul.f32 %v1285_v15, %v1285_v15  ;;  %v3210_v48 = vadd.f32 %v999_v42, %v967_v26 }
 0x133   : > { %vm1392_vm9 = vcmp.eq.f32.partialorder %v3124_v16, 0.0  ;;  %v1393_v61 = vand.u32 2147483648, %v3124_v16  ;;  %v453_v8 = vrot.slane %v3203_v28, 1  ;;  %v502_v38 = vrot.slane %v3203_v28, 7 }
 0x134   : > { %v1885_v29 = vpop.eup %1884  ;;  %v1333_v34 = vadd.f32 %v1317_v36, %v1301_v21  ;;  %v647_v58 = vrot.slane %v3205_v14, 1  ;;  %v1047_v4 = vrot.slane %v3210_v48, 1  ;;  %v1095_v13 = vrot.slane %v3210_v48, 7 }
 0x135   : > { %v799_v45 = vsel %vm798_vm6, %v3069_v24, %v797_v50  ;;  %v1389_v11 = vmul.f32 %v1885_v29, %v3124_v16  ;;  %v471_v56 = vsel %vm462_vm3, %v452_v44, %v453_v8  ;;  %v3235_v12 = vsel %vm511_vm4, %v501_v39, %v502_v38  ;;  %v303_v39 = vpop.permute.xlu0 %302 }
 0x136   : > { %v1158_v9 = vrot.slane %v3131_v43, 7  ;;  %v3238_v17 = vadd.f32 1e-18, %v1333_v34  ;;  %v550_v18 = vsub.f32 %v471_v56, %v3101_v10  ;;  %v664_v44 = vsel %vm462_vm3, %v646_v52, %v647_v58 }
 0x137   : > { %v1391_v33 = vsel %vm1390_vm8, %v3124_v16, %v1389_v11  ;;  %v694_v19 = vadd.f32 %v664_v44, %v630_v54  ;;  %v1064_v10 = vsel %vm462_vm3, %v1046_v53, %v1047_v4  ;;  %v3262_v52 = vsel %vm511_vm4, %v1094_v60, %v1095_v13  ;;  %v351_v16 = vpop.permute.xlu1 %350 }
 0x138   : > { %v802_v15 = vsel %vm800_vm7, %v801_v62, %v799_v45  ;;  %v1394_v36 = vsel %vm1392_vm9, %v1393_v61, %v1391_v33  ;;  %v1206_v42 = vmul.f32 2.0, %v3131_v43  ;;  %1890 = vrsqrt.f32 %v3238_v17 }
 0x139   : > { %v1887_v1 = vpop.eup %1886  ;;  %v1476_v53 = vsub.f32 %v1394_v36, %v802_v15  ;;  %v710_v50 = vmul.f32 %v694_v19, %v694_v19  ;;  %v726_v54 = vmul.f32 %v550_v18, %v550_v18  ;;  %v3270_v21 = vsub.f32 %v967_v26, %v919_v7  ;;  %v897_v44 = vpop.permute.xlu0 %896 }
 0x13a   : > { %vm1507_vm10 = vcmp.eq.f32.partialorder %v3134_v59, 0.0  ;;  %v1558_v20 = vmul.f32 %v1887_v1, %v3156_v5  ;;  %v567_v24 = vrot.slane %v3205_v14, 7  ;;  %v1142_v60 = vsub.f32 %v1064_v10, %v3150_v27 }
 0x13b   : > { %vm1559_vm11 = vcmp.eq.f32.partialorder %v3156_v5, inf  ;;  %v1562_v62 = vand.u32 2147483648, %v3156_v5  ;;  %v3278_v61 = vmul.f32 %v1476_v53, %v1476_v53  ;;  %v742_v29 = vadd.f32 %v726_v54, %v710_v50  ;;  %v945_v15 = vpop.permute.xlu1 %944 }
 0x13c   : > { %v1889_v34 = vpop.eup %1888  ;;  %v1560_v7 = vsel %vm1559_vm11, %v3156_v5, %v1558_v20  ;;  %vm1561_vm12 = vcmp.eq.f32.partialorder %v3156_v5, 0.0  ;;  %v1177_v27 = vsel %vm511_vm4, %v1157_v57, %v1158_v9  ;;  %v326_v26 = vsel %vm252_vm1, %v303_v39, 0.0 }
 0x13d   : > { %v1563_v45 = vsel %vm1561_vm12, %v1562_v62, %v1560_v7  ;;  %v3291_v11 = vadd.f32 1e-18, %v3278_v61  ;;  %v615_v56 = vmul.f32 2.0, %v3205_v14  ;;  %v1239_v18 = vrot.slane %v3270_v21, 1 }
 0x13e   : > { %v1651_v5 = vsel %vm1507_vm10, 0.0, %v1563_v45  ;;  %vm805_vm13 = vcmp.eq.f32.partialorder %v3165_v0, inf  ;;  %vm807_vm14 = vcmp.eq.f32.partialorder %v3165_v0, 0.0  ;;  %v584_v22 = vsel %vm511_vm4, %v566_v51, %v567_v24 }
 0x13f   : > { %v3306_v57 = vadd.f32 %v3172_v25, %v1651_v5  ;;  %1892 = vrsqrt.f32 %v3291_v11  ;;  %v808_v33 = vand.u32 2147483648, %v3165_v0  ;;  %v3310_v59 = vadd.f32 1e-18, %v742_v29 }
 0x140   : > { %v804_v19 = vmul.f32 %v1889_v34, %v3165_v0  ;;  %v1222_v39 = vadd.f32 %v1206_v42, %v1177_v27  ;;  %v406_v10 = vadd.f32 %v3175_v35, %v326_v26  ;;  %v920_v47 = vsel %vm252_vm1, %v897_v44, 0.0 }
 0x141   : > { %vm1397_vm15 = vcmp.eq.f32.partialorder %v3238_v17, inf  ;;  %v631_v51 = vadd.f32 %v615_v56, %v584_v22  ;;  %v1256_v25 = vsel %vm462_vm3, %v1238_v37, %v1239_v18  ;;  %v374_v36 = vsel %vm253_vm0, %v351_v16, 0.0 }
 0x142   : > { %v1286_v42 = vadd.f32 %v1256_v25, %v1222_v39  ;;  %v1318_v1 = vmul.f32 %v1142_v60, %v1142_v60  ;;  %v3325_v35 = vadd.f32 %v406_v10, %v374_v36  ;;  %v3327_v53 = vsub.f32 %v374_v36, %v326_v26  ;;  %v353_v36 = vpop.permute.xlu1 %352 }
 0x143   : > { %vm1399_vm2 = vcmp.eq.f32.partialorder %v3238_v17, 0.0  ;;  %1894 = vrsqrt.f32 %v3310_v59  ;;  %v1000_v50 = vadd.f32 %v3178_v63, %v920_v47  ;;  %v968_v54 = vsel %vm253_vm0, %v945_v15, 0.0 }
 0x144   : > { %v806_v37 = vsel %vm805_vm13, %v3165_v0, %v804_v19  ;;  %v1302_v20 = vmul.f32 %v1286_v42, %v1286_v42  ;;  %v454_v60 = vrot.slane %v3325_v35, 1  ;;  %v503_v16 = vrot.slane %v3325_v35, 7  ;;  %v305_v0 = vpop.permute.xlu0 %304 }
 0x145   : > { %v1891_v62 = vpop.eup %1890  ;;  %v1400_v29 = vand.u32 2147483648, %v3238_v17  ;;  %v1159_v34 = vrot.slane %v3270_v21, 7  ;;  %v648_v7 = vrot.slane %v3327_v53, 1  ;;  %v3342_v63 = vadd.f32 %v1000_v50, %v968_v54  ;;  %v1956_v50 = vld [vmem:[%s2276_s19 + $0x48] sm:$0xff] }
 0x146   : > { %v1396_v27 = vmul.f32 %v1891_v62, %v3238_v17  ;;  %v1334_v26 = vadd.f32 %v1318_v1, %v1302_v20  ;;  %v470_v45 = vsel %vm462_vm3, %v453_v8, %v454_v60  ;;  %v3357_v56 = vsel %vm511_vm4, %v502_v38, %v503_v16  ;;  %v1957_v20 = vld [vmem:[%s2283_s29 + $0x48] sm:$0xff] }
 0x147   : > { %v809_v44 = vsel %vm807_vm14, %v808_v33, %v806_v37  ;;  %v551_v5 = vsub.f32 %v470_v45, %v3235_v12  ;;  %v663_v8 = vsel %vm462_vm3, %v647_v58, %v648_v7  ;;  %v1048_v22 = vrot.slane %v3342_v63, 1 }
 0x148   : > { %v1398_v28 = vsel %vm1397_vm15, %v3238_v17, %v1396_v27  ;;  %v3372_v38 = vadd.f32 1e-18, %v1334_v26  ;;  %v695_v19 = vadd.f32 %v663_v8, %v631_v51  ;;  %v3374_v33 = vsub.f32 %v968_v54, %v920_v47 }
 0x149   : > { %v1401_v12 = vsel %vm1399_vm2, %v1400_v29, %v1398_v28  ;;  %v727_v39 = vmul.f32 %v551_v5, %v551_v5  ;;  %v1063_v58 = vsel %vm462_vm3, %v1047_v4, %v1048_v22  ;;  %v1096_v10 = vrot.slane %v3342_v63, 7  ;;  %v899_v29 = vpop.permute.xlu0 %898 }
 0x14a   : > { %v1477_v15 = vsub.f32 %v1401_v12, %v809_v44  ;;  %v1207_v51 = vmul.f32 2.0, %v3270_v21  ;;  %1896 = vrsqrt.f32 %v3372_v38  ;;  %v568_v47 = vrot.slane %v3327_v53, 7 }
 0x14b   : > { %v711_v17 = vmul.f32 %v695_v19, %v695_v19  ;;  %v3394_v25 = vsel %vm511_vm4, %v1095_v13, %v1096_v10  ;;  %v1143_v4 = vsub.f32 %v1063_v58, %v3262_v52  ;;  %v1176_v1 = vsel %vm511_vm4, %v1158_v9, %v1159_v34 }
 0x14c   : > { %v1893_v42 = vpop.eup %1892  ;;  %v391_v54 = vmul.f32 2.0, %v1956_v50  ;;  %v1240_v37 = vrot.slane %v3374_v33, 1  ;;  %vm1508_vm5 = vcmp.eq.f32.partialorder %v3278_v61, 0.0  ;;  %v985_v52 = vmul.f32 2.0, %v1957_v20 }
 0x14d   : > { %v1565_v48 = vmul.f32 %v1893_v42, %v3291_v11  ;;  %v743_v13 = vadd.f32 %v727_v39, %v711_v17  ;;  %vm1566_vm6 = vcmp.eq.f32.partialorder %v3291_v11, inf  ;;  %v1569_v62 = vand.u32 2147483648, %v3291_v11 }
 0x14e   : > { %v616_v43 = vmul.f32 2.0, %v3327_v53  ;;  %v327_v9 = vsel %vm252_vm1, %v305_v0, 0.0  ;;  %vm1568_vm7 = vcmp.eq.f32.partialorder %v3291_v11, 0.0  ;;  %v1223_v26 = vadd.f32 %v1207_v51, %v1176_v1  ;;  %v947_v0 = vpop.permute.xlu1 %946 }
 0x14f   : > { %v1567_v27 = vsel %vm1566_vm6, %v3291_v11, %v1565_v48  ;;  %v583_v45 = vsel %vm511_vm4, %v567_v24, %v568_v47  ;;  %vm812_vm8 = vcmp.eq.f32.partialorder %v3310_v59, inf  ;;  %v1255_v8 = vsel %vm462_vm3, %v1239_v18, %v1240_v37 }
 0x150   : > { %v1895_v44 = vpop.eup %1894  ;;  %v1570_v5 = vsel %vm1568_vm7, %v1569_v62, %v1567_v27  ;;  %v375_v11 = vsel %vm253_vm0, %v353_v36, 0.0  ;;  %v3432_v28 = vadd.f32 1e-18, %v743_v13  ;;  %v407_v24 = vadd.f32 %v391_v54, %v327_v9 }
 0x151   : > { %v1652_v14 = vsel %vm1508_vm5, 0.0, %v1570_v5  ;;  %v921_v19 = vsel %vm252_vm1, %v899_v29, 0.0  ;;  %vm814_vm9 = vcmp.eq.f32.partialorder %v3310_v59, 0.0  ;;  %v815_v18 = vand.u32 2147483648, %v3310_v59  ;;  %v307_v5 = vpop.permute.xlu0 %306 }
 0x152   : > { %v3437_v12 = vadd.f32 %v3306_v57, %v1652_v14  ;;  %v632_v39 = vadd.f32 %v616_v43, %v583_v45  ;;  %v1319_v58 = vmul.f32 %v1143_v4, %v1143_v4  ;;  %v811_v51 = vmul.f32 %v1895_v44, %v3310_v59 }
 0x153   : > { %v1287_v61 = vadd.f32 %v1255_v8, %v1223_v26  ;;  %v3442_v17 = vadd.f32 %v407_v24, %v375_v11  ;;  %v3444_v36 = vsub.f32 %v375_v11, %v327_v9  ;;  %vm1404_vm10 = vcmp.eq.f32.partialorder %v3372_v38, inf }
 0x154   : > { %v1407_v42 = vand.u32 2147483648, %v3372_v38  ;;  %v1001_v1 = vadd.f32 %v985_v52, %v921_v19  ;;  %v969_v57 = vsel %vm253_vm0, %v947_v0, 0.0  ;;  %1898 = vrsqrt.f32 %v3432_v28 }
 0x155   : > { %v1303_v50 = vmul.f32 %v1287_v61, %v1287_v61  ;;  %v455_v4 = vrot.slane %v3442_v17, 1  ;;  %v504_v54 = vrot.slane %v3442_v17, 7  ;;  %v3453_v48 = vmul.f32 %v1477_v15, %v1477_v15  ;;  %v1958_v61 = vld [vmem:[%s2276_s19 + $0x50] sm:$0xff] }
 0x156   : > { %v1160_v13 = vrot.slane %v3374_v33, 7  ;;  %v649_v20 = vrot.slane %v3444_v36, 1  ;;  %v3457_v62 = vadd.f32 %v1001_v1, %v969_v57  ;;  %v813_v52 = vsel %vm812_vm8, %v3310_v59, %v811_v51 }
 0x157   : > { %v1897_v43 = vpop.eup %1896  ;;  %v1335_v9 = vadd.f32 %v1319_v58, %v1303_v50  ;;  %v469_v15 = vsel %vm462_vm3, %v454_v60, %v455_v4  ;;  %v3474_v29 = vsel %vm511_vm4, %v503_v16, %v504_v54  ;;  %v3484_v60 = vsub.f32 %v969_v57, %v921_v19  ;;  %v901_v57 = vpop.permute.xlu0 %900 }
 0x158   : > { %v1403_v27 = vmul.f32 %v1897_v43, %v3372_v38  ;;  %v552_v26 = vsub.f32 %v469_v15, %v3357_v56  ;;  %v662_v45 = vsel %vm462_vm3, %v648_v7, %v649_v20  ;;  %v1049_v16 = vrot.slane %v3457_v62, 1 }
 0x159   : > { %v3486_v44 = vadd.f32 1e-18, %v1335_v9  ;;  %v696_v35 = vadd.f32 %v662_v45, %v632_v39  ;;  %v1097_v8 = vrot.slane %v3457_v62, 7  ;;  %v3491_v11 = vadd.f32 1e-18, %v3453_v48  ;;  %v1959_v9 = vld [vmem:[%s2283_s29 + $0x50] sm:$0xff] }
 0x15a   : > { %v1405_v56 = vsel %vm1404_vm10, %v3372_v38, %v1403_v27  ;;  %vm1406_vm11 = vcmp.eq.f32.partialorder %v3372_v38, 0.0  ;;  %v728_v7 = vmul.f32 %v552_v26, %v552_v26  ;;  %v816_v14 = vsel %vm814_vm9, %v815_v18, %v813_v52  ;;  %v355_v18 = vpop.permute.xlu1 %354 }
 0x15b   : > { %v1408_v24 = vsel %vm1406_vm11, %v1407_v42, %v1405_v56  ;;  %v1208_v19 = vmul.f32 2.0, %v3374_v33  ;;  %1900 = vrsqrt.f32 %v3486_v44  ;;  %v1175_v39 = vsel %vm511_vm4, %v1159_v34, %v1160_v13 }
 0x15c   : > { %v3501_v0 = vsub.f32 %v1408_v24, %v816_v14  ;;  %v712_v38 = vmul.f32 %v696_v35, %v696_v35  ;;  %v1062_v59 = vsel %vm462_vm3, %v1048_v22, %v1049_v16  ;;  %v3521_v58 = vsel %vm511_vm4, %v1096_v10, %v1097_v8 }
 0x15d   : > { %v1144_v21 = vsub.f32 %v1062_v59, %v3394_v25  ;;  %v1241_v34 = vrot.slane %v3484_v60, 1  ;;  %v3526_v51 = vadd.s32 120, %v2471_v40  ;;  %1902 = vrsqrt.f32 %v3491_v11 }
 0x15e   : > { %v744_v22 = vadd.f32 %v728_v7, %v712_v38  ;;  %v392_v42 = vmul.f32 2.0, %v1958_v61  ;;  %v1224_v1 = vadd.f32 %v1208_v19, %v1175_v39  ;;  %v569_v63 = vrot.slane %v3444_v36, 7  ;;  %v949_v56 = vpop.permute.xlu1 %948 }
 0x15f   : > { %v328_v10 = vsel %vm252_vm1, %v307_v5, 0.0  ;;  %v1254_v25 = vsel %vm462_vm3, %v1240_v37, %v1241_v34  ;;  %v1320_v52 = vmul.f32 %v1144_v21, %v1144_v21  ;;  %v986_v15 = vmul.f32 2.0, %v1959_v9  ;;  %v309_v9 = vpop.permute.xlu0 %308 }
 0x160   : > { %v3539_v50 = vadd.f32 1e-18, %v744_v22  ;;  %v1288_v43 = vadd.f32 %v1254_v25, %v1224_v1  ;;  %v376_v27 = vsel %vm253_vm0, %v355_v18, 0.0  ;;  %vm285_vm12 = vcmp.lt.s32.totalorder %v3526_v51, 127 }
 0x161   : > { %v1899_v26 = vpop.eup %1898  ;;  %v3546_v45 = vmul.f32 2.0, %v2484_v49  ;;  %v617_v35 = vmul.f32 2.0, %v3444_v36  ;;  %v408_v5 = vadd.f32 %v392_v42, %v328_v10  ;;  %v922_v37 = vsel %vm252_vm1, %v901_v57, 0.0 }
 0x162   : > { %vm819_vm13 = vcmp.eq.f32.partialorder %v3432_v28, inf  ;;  %v582_v7 = vsel %vm511_vm4, %v568_v47, %v569_v63  ;;  %1904 = vrsqrt.f32 %v3539_v50  ;;  %v1304_v14 = vmul.f32 %v1288_v43, %v1288_v43 }
 0x163   : > { %vm821_vm14 = vcmp.eq.f32.partialorder %v3432_v28, 0.0  ;;  %v822_v24 = vand.u32 2147483648, %v3432_v28  ;;  %v3561_v19 = vadd.f32 %v408_v5, %v376_v27  ;;  %v3563_v39 = vsub.f32 %v376_v27, %v328_v10 }
 0x164   : > { %v818_v38 = vmul.f32 %v1899_v26, %v3432_v28  ;;  %v1336_v59 = vadd.f32 %v1320_v52, %v1304_v14  ;;  %v1002_v18 = vadd.f32 %v986_v15, %v922_v37  ;;  %v970_v53 = vsel %vm253_vm0, %v949_v56, 0.0 }
 0x165   : > { %v633_v21 = vadd.f32 %v617_v35, %v582_v7  ;;  %v1161_v47 = vrot.slane %v3484_v60, 7  ;;  %v456_v22 = vrot.slane %v3561_v19, 1  ;;  %v505_v61 = vrot.slane %v3561_v19, 7 }
 0x166   : > { %v1209_v42 = vmul.f32 2.0, %v3484_v60  ;;  %v3572_v1 = vadd.f32 1e-18, %v1336_v59  ;;  %v650_v10 = vrot.slane %v3563_v39, 1  ;;  %v3575_v25 = vadd.f32 %v1002_v18, %v970_v53 }
 0x167   : > { %vm1411_vm15 = vcmp.eq.f32.partialorder %v3486_v44, inf  ;;  %vm1413_vm2 = vcmp.eq.f32.partialorder %v3486_v44, 0.0  ;;  %v468_v43 = vsel %vm462_vm3, %v455_v4, %v456_v22  ;;  %v3591_v52 = vsel %vm511_vm4, %v504_v54, %v505_v61  ;;  %v1960_v54 = vld [vmem:[%s2276_s19 + $0x58] sm:$0xff] }
 0x168   : > { %v1901_v57 = vpop.eup %1900  ;;  %v820_v15 = vsel %vm819_vm13, %v3432_v28, %v818_v38  ;;  %v1414_v26 = vand.u32 2147483648, %v3486_v44  ;;  %1906 = vrsqrt.f32 %v3572_v1  ;;  %v553_v4 = vsub.f32 %v468_v43, %v3474_v29 }
 0x169   : > { %v1410_v27 = vmul.f32 %v1901_v57, %v3486_v44  ;;  %v661_v17 = vsel %vm462_vm3, %v649_v20, %v650_v10  ;;  %v393_v35 = vmul.f32 2.0, %v1960_v54  ;;  %v3607_v5 = vsub.f32 %v970_v53, %v922_v37  ;;  %v357_v53 = vpop.permute.xlu1 %356 }
 0x16a   : > { %v1903_v56 = vpop.eup %1902  ;;  %v697_v14 = vadd.f32 %v661_v17, %v633_v21  ;;  %v329_v38 = vsel %vm252_vm1, %v309_v9, 0.0  ;;  %v1050_v29 = vrot.slane %v3575_v25, 1  ;;  %v823_v59 = vsel %vm821_vm14, %v822_v24, %v820_v15 }
 0x16b   : > { %v1412_v7 = vsel %vm1411_vm15, %v3486_v44, %v1410_v27  ;;  %v1174_v20 = vsel %vm511_vm4, %v1160_v13, %v1161_v47  ;;  %v729_v37 = vmul.f32 %v553_v4, %v553_v4  ;;  %v3626_v21 = vsel %vm285_vm12, %v2517_v3, 0.0 }
 0x16c   : > { %v1415_v18 = vsel %vm1413_vm2, %v1414_v26, %v1412_v7  ;;  %v713_v28 = vmul.f32 %v697_v14, %v697_v14  ;;  %v1061_v44 = vsel %vm462_vm3, %v1049_v16, %v1050_v29  ;;  %v1572_v33 = vmul.f32 %v1903_v56, %v3491_v11  ;;  %v1961_v14 = vld [vmem:[%s2283_s29 + $0x58] sm:$0xff] }
 0x16d   : > { %v1479_v57 = vsub.f32 %v1415_v18, %v823_v59  ;;  %v409_v24 = vadd.f32 %v393_v35, %v329_v38  ;;  %v1145_v13 = vsub.f32 %v1061_v44, %v3521_v58  ;;  %v1242_v43 = vrot.slane %v3607_v5, 1  ;;  %v903_v58 = vpop.permute.xlu0 %902 }
 0x16e   : > { %v1225_v9 = vadd.f32 %v1209_v42, %v1174_v20  ;;  %v570_v3 = vrot.slane %v3563_v39, 7  ;;  %v745_v15 = vadd.f32 %v729_v37, %v713_v28  ;;  %v377_v27 = vsel %vm253_vm0, %v357_v53, 0.0  ;;  %v951_v28 = vpop.permute.xlu1 %950 }
 0x16f   : > { %v1905_v26 = vpop.eup %1904  ;;  %v3641_v4 = vmul.f32 2.0, %v2543_v32  ;;  %v1253_v16 = vsel %vm462_vm3, %v1241_v34, %v1242_v43  ;;  %v3649_v42 = vadd.f32 %v409_v24, %v377_v27  ;;  %v3654_v17 = vsel %vm285_vm12, %v2529_v23, 0.0 }
 0x170   : > { %vm1573_vm5 = vcmp.eq.f32.partialorder %v3491_v11, inf  ;;  %v3659_v54 = vmul.f32 %v3501_v0, %v3501_v0  ;;  %v1289_v35 = vadd.f32 %v1253_v16, %v1225_v9  ;;  %v3661_v56 = vsub.f32 %v377_v27, %v329_v38 }
 0x171   : > { %v825_v7 = vmul.f32 %v1905_v26, %v3539_v50  ;;  %v618_v34 = vmul.f32 2.0, %v3563_v39  ;;  %v987_v59 = vmul.f32 2.0, %v1961_v14  ;;  %v457_v18 = vrot.slane %v3649_v42, 1  ;;  %v311_v26 = vpop.permute.xlu0 %310 }
 0x172   : > { %v1574_v23 = vsel %vm1573_vm5, %v3491_v11, %v1572_v33  ;;  %v581_v0 = vsel %vm511_vm4, %v569_v63, %v570_v3  ;;  %v3674_v20 = vadd.f32 1e-18, %v745_v15  ;;  %v923_v38 = vsel %vm252_vm1, %v903_v58, 0.0 }
 0x173   : > { %vm826_vm6 = vcmp.eq.f32.partialorder %v3539_v50, inf  ;;  %vm828_vm7 = vcmp.eq.f32.partialorder %v3539_v50, 0.0  ;;  %v1305_v37 = vmul.f32 %v1289_v35, %v1289_v35  ;;  %v1321_v53 = vmul.f32 %v1145_v13, %v1145_v13 }
 0x174   : > { %vm1575_vm8 = vcmp.eq.f32.partialorder %v3491_v11, 0.0  ;;  %v829_v44 = vand.u32 2147483648, %v3539_v50  ;;  %vm1418_vm9 = vcmp.eq.f32.partialorder %v3572_v1, inf  ;;  %v467_v36 = vsel %vm462_vm3, %v456_v22, %v457_v18 }
 0x175   : > { %v651_v63 = vrot.slane %v3661_v56, 1  ;;  %v1907_v33 = vpop.eup %1906  ;;  %v827_v24 = vsel %vm826_vm6, %v3539_v50, %v825_v7  ;;  %v634_v13 = vadd.f32 %v618_v34, %v581_v0  ;;  %v1003_v9 = vadd.f32 %v987_v59, %v923_v38 }
 0x176   : > { %v554_v15 = vsub.f32 %v467_v36, %v3591_v52  ;;  %v1417_v27 = vmul.f32 %v1907_v33, %v3572_v1  ;;  %1908 = vrsqrt.f32 %v3674_v20  ;;  %v971_v16 = vsel %vm253_vm0, %v951_v28, 0.0 }
 0x177   : > { %v660_v22 = vsel %vm462_vm3, %v650_v10, %v651_v63  ;;  %vm1420_vm10 = vcmp.eq.f32.partialorder %v3572_v1, 0.0  ;;  %v1421_v58 = vand.u32 2147483648, %v3572_v1  ;;  %v1162_v52 = vrot.slane %v3607_v5, 7 }
 0x178   : > { %v1337_v35 = vadd.f32 %v1321_v53, %v1305_v37  ;;  %v1419_v7 = vsel %vm1418_vm9, %v3572_v1, %v1417_v27  ;;  %v698_v34 = vadd.f32 %v660_v22, %v634_v13  ;;  %v3708_v14 = vadd.f32 %v1003_v9, %v971_v16  ;;  %v359_v13 = vpop.permute.xlu1 %358 }
 0x179   : > { %v3710_v10 = vsub.f32 %v971_v16, %v923_v38  ;;  %v3713_v59 = vadd.f32 1e-18, %v3659_v54  ;;  %v830_v0 = vsel %vm828_vm7, %v829_v44, %v827_v24  ;;  %v1422_v28 = vsel %vm1420_vm10, %v1421_v58, %v1419_v7  ;;  %v1962_v44 = vld [vmem:[%s2276_s19 + $0x60] sm:$0xff]  ;;  %v905_v58 = vpop.permute.xlu0 %904 }
 0x17a   : > { %v1098_v36 = vrot.slane %v3575_v25, 7  ;;  %v3718_v37 = vmul.f32 %v1479_v57, %v1479_v57  ;;  %v3720_v53 = vsub.f32 %v1422_v28, %v830_v0  ;;  %v1210_v1 = vmul.f32 2.0, %v3607_v5 }
 0x17b   : > { %v1051_v33 = vrot.slane %v3708_v14, 1  ;;  %v1576_v38 = vand.u32 2147483648, %v3491_v11  ;;  %v1173_v50 = vsel %vm511_vm4, %v1161_v47, %v1162_v52  ;;  %v394_v24 = vmul.f32 2.0, %v1962_v44 }
 0x17c   : > { %v1243_v57 = vrot.slane %v3710_v10, 1  ;;  %v3733_v9 = vadd.f32 1e-18, %v1337_v35  ;;  %v714_v27 = vmul.f32 %v698_v34, %v698_v34  ;;  %v730_v22 = vmul.f32 %v554_v15, %v554_v15  ;;  %v1963_v34 = vld [vmem:[%s2283_s29 + $0x60] sm:$0xff]  ;;  %v953_v0 = vpop.permute.xlu1 %952 }
 0x17d   : > { %v330_v16 = vsel %vm252_vm1, %v311_v26, 0.0  ;;  %v3740_v60 = vsel %vm285_vm12, %v2569_v6, 0.0  ;;  %v3745_v47 = vsel %vm285_vm12, %v2585_v2, 0.0  ;;  %v3749_v35 = vsel %vm1575_vm8, %v1576_v38, %v1574_v23 }
 0x17e   : > { %1910 = vrsqrt.f32 %v3713_v59  ;;  %v3753_v15 = vadd.f32 1e-18, %v3718_v37  ;;  %v1109_v6 = vsel %vm511_vm4, %v1097_v8, %v1098_v36  ;;  %v1226_v26 = vadd.f32 %v1210_v1, %v1173_v50 }
 0x17f   : > { %v1060_v2 = vsel %vm462_vm3, %v1050_v29, %v1051_v33  ;;  %v571_v11 = vrot.slane %v3661_v56, 7  ;;  %v410_v51 = vadd.f32 %v394_v24, %v330_v16  ;;  %v1252_v62 = vsel %vm462_vm3, %v1242_v43, %v1243_v57  ;;  %v313_v24 = vpop.permute.xlu0 %312 }
 0x180   : > { %v378_v8 = vsel %vm253_vm0, %v359_v13, 0.0  ;;  %1912 = vrsqrt.f32 %v3733_v9  ;;  %v746_v23 = vadd.f32 %v730_v22, %v714_v27  ;;  %v4364_v7 = vrot.slane %v3710_v10, 7 }
 0x181   : > { %v988_v29 = vmul.f32 2.0, %v1963_v34  ;;  %v1146_v28 = vsub.f32 %v1060_v2, %v1109_v6  ;;  %v924_v1 = vsel %vm252_vm1, %v905_v58, 0.0  ;;  %v3781_v38 = vadd.f32 %v410_v51, %v378_v8 }
 0x182   : > { %v3783_v50 = vsub.f32 %v378_v8, %v330_v16  ;;  %1914 = vrsqrt.f32 %v3753_v15  ;;  %v506_v43 = vrot.slane %v3649_v42, 7  ;;  %v619_v13 = vmul.f32 2.0, %v3661_v56 }
 0x183   : > { %v1290_v44 = vadd.f32 %v1252_v62, %v1226_v26  ;;  %v1909_v27 = vpop.eup %1908  ;;  %vm833_vm11 = vcmp.eq.f32.partialorder %v3674_v20, inf  ;;  %v836_v22 = vand.u32 2147483648, %v3674_v20  ;;  %v580_v16 = vsel %vm511_vm4, %v570_v3, %v571_v11 }
 0x184   : > { %v972_v58 = vsel %vm253_vm0, %v953_v0, 0.0  ;;  %vm835_vm12 = vcmp.eq.f32.partialorder %v3674_v20, 0.0  ;;  %v1099_v6 = vrot.slane %v3708_v14, 7  ;;  %v1004_v26 = vadd.f32 %v988_v29, %v924_v1  ;;  %v1964_v29 = vld [vmem:[%s2276_s19 + $0x68] sm:$0xff]  ;;  %v1967_v14 = vld [vmem:[%s2276_s19 + $0x70] sm:$0xff] }
 0x185   : > { %v458_v2 = vrot.slane %v3781_v38, 1  ;;  %v652_v51 = vrot.slane %v3783_v50, 1  ;;  %v3802_v62 = vadd.f32 1e-18, %v746_v23  ;;  %v1172_v39 = vsel %vm511_vm4, %v1162_v52, %v4364_v7  ;;  %v361_v7 = vpop.permute.xlu1 %360 }
 0x186   : > { %v1211_v3 = vmul.f32 2.0, %v3710_v10  ;;  %v1322_v8 = vmul.f32 %v1146_v28, %v1146_v28  ;;  %v832_v34 = vmul.f32 %v1909_v27, %v3674_v20  ;;  %v1306_v0 = vmul.f32 %v1290_v44, %v1290_v44 }
 0x187   : > { %v395_v46 = vmul.f32 2.0, %v1964_v29  ;;  %v3813_v41 = vadd.f32 %v1004_v26, %v972_v58  ;;  %v516_v5 = vsel %vm511_vm4, %v505_v61, %v506_v43  ;;  %v635_v52 = vadd.f32 %v619_v13, %v580_v16 }
 0x188   : > { %v331_v28 = vsel %vm252_vm1, %v313_v24, 0.0  ;;  %v3826_v44 = vmul.f32 %v3720_v53, %v3720_v53  ;;  %v1108_v27 = vsel %vm511_vm4, %v1098_v36, %v1099_v6  ;;  %v466_v19 = vsel %vm462_vm3, %v457_v18, %v458_v2  ;;  %v907_v53 = vpop.permute.xlu0 %906 }
 0x189   : > { %v659_v61 = vsel %vm462_vm3, %v651_v63, %v652_v51  ;;  %1916 = vrsqrt.f32 %v3802_v62  ;;  %v1227_v25 = vadd.f32 %v1211_v3, %v1172_v39  ;;  %v3847_v13 = vsub.f32 %v972_v58, %v924_v1 }
 0x18a   : > { %v1052_v36 = vrot.slane %v3813_v41, 1  ;;  %v834_v18 = vsel %vm833_vm11, %v3674_v20, %v832_v34  ;;  %v1338_v16 = vadd.f32 %v1322_v8, %v1306_v0  ;;  %v411_v26 = vadd.f32 %v395_v46, %v331_v28 }
 0x18b   : > { %v3850_v24 = vpop.eup %1910  ;;  %v379_v63 = vsel %vm253_vm0, %v361_v7, 0.0  ;;  %v4366_v29 = vrot.slane %v3781_v38, 7  ;;  %v555_v23 = vsub.f32 %v466_v19, %v516_v5  ;;  %v699_v39 = vadd.f32 %v659_v61, %v635_v52  ;;  %v1965_v5 = vld [vmem:[%s2283_s29 + $0x68] sm:$0xff] }
 0x18c   : > { %v1059_v1 = vsel %vm462_vm3, %v1051_v33, %v1052_v36  ;;  %vm1425_vm13 = vcmp.eq.f32.partialorder %v3733_v9, inf  ;;  %v4365_v58 = vrot.slane %v3783_v50, 7  ;;  %v4369_v46 = vrot.slane %v3847_v13, 1  ;;  %v315_v61 = vpop.permute.xlu0 %314 }
 0x18d   : > { %v1147_v3 = vsub.f32 %v1059_v1, %v1108_v27  ;;  %v3867_v8 = vadd.f32 %v411_v26, %v379_v63  ;;  %v1913_v7 = vpop.eup %1912  ;;  %v3871_v34 = vsel %vm835_vm12, %v836_v22, %v834_v18  ;;  %v989_v52 = vmul.f32 2.0, %v1965_v5 }
 0x18e   : > { %v925_v33 = vsel %vm252_vm1, %v907_v53, 0.0  ;;  %v3877_v19 = vadd.f32 1e-18, %v1338_v16  ;;  %v620_v27 = vmul.f32 2.0, %v3783_v50  ;;  %v1251_v20 = vsel %vm462_vm3, %v1243_v57, %v4369_v46 }
 0x18f   : > { %v3886_v22 = vsub.f32 %v379_v63, %v331_v28  ;;  %v3888_v18 = vpop.eup %1914  ;;  %v715_v26 = vmul.f32 %v699_v39, %v699_v39  ;;  %v731_v1 = vmul.f32 %v555_v23, %v555_v23  ;;  %v1291_v5 = vadd.f32 %v1251_v20, %v1227_v25  ;;  %v955_v28 = vpop.permute.xlu1 %954 }
 0x190   : > { %v4368_v53 = vrot.slane %v3867_v8, 1  ;;  %v1424_v16 = vmul.f32 %v1913_v7, %v3733_v9  ;;  %v515_v0 = vsel %vm511_vm4, %v506_v43, %v4366_v29  ;;  %v579_v57 = vsel %vm511_vm4, %v571_v11, %v4365_v58 }
 0x191   : > { %v1323_v23 = vmul.f32 %v1147_v3, %v1147_v3  ;;  %v1100_v25 = vrot.slane %v3813_v41, 7  ;;  %v1164_v63 = vrot.slane %v3847_v13, 7  ;;  %v1307_v39 = vmul.f32 %v1291_v5, %v1291_v5 }
 0x192   : > { %v465_v42 = vsel %vm462_vm3, %v458_v2, %v4368_v53  ;;  %1918 = vrsqrt.f32 %v3877_v19  ;;  %v1005_v56 = vadd.f32 %v989_v52, %v925_v33  ;;  %v4367_v11 = vrot.slane %v3886_v22, 1  ;;  %v909_v52 = vpop.permute.xlu0 %908 }
 0x193   : > { %v556_v43 = vsub.f32 %v465_v42, %v515_v0  ;;  %v636_v7 = vadd.f32 %v620_v27, %v579_v57  ;;  %v747_v20 = vadd.f32 %v731_v1, %v715_v26  ;;  %v973_v5 = vsel %vm253_vm0, %v955_v28, 0.0 }
 0x194   : > { %v1212_v58 = vmul.f32 2.0, %v3847_v13  ;;  %v1339_v29 = vadd.f32 %v1323_v23, %v1307_v39  ;;  %v658_v2 = vsel %vm462_vm3, %v652_v51, %v4367_v11  ;;  %v3924_v0 = vadd.f32 %v1005_v56, %v973_v5  ;;  %v1966_v56 = vld [vmem:[%s2283_s29 + $0x70] sm:$0xff] }
 0x195   : > { %v3929_v27 = vsel %vm1425_vm13, %v3733_v9, %v1424_v16  ;;  %v1107_v26 = vsel %vm511_vm4, %v1099_v6, %v1100_v25  ;;  %v4377_v1 = vrot.slane %v3710_v10, 7  ;;  %v700_v23 = vadd.f32 %v658_v2, %v636_v7  ;;  %v957_v7 = vpop.permute.xlu1 %956 }
 0x196   : > { %v3939_v51 = vpop.eup %1916  ;;  %v732_v28 = vmul.f32 %v556_v43, %v556_v43  ;;  %v1037_v39 = vsub.f32 %v973_v5, %v925_v33  ;;  %v1053_v42 = vrot.slane %v3924_v0, 1  ;;  %v990_v16 = vmul.f32 2.0, %v1966_v56 }
 0x197   : > { %v1171_v57 = vsel %vm511_vm4, %v4377_v1, %v1164_v63  ;;  %v3943_v3 = vadd.f32 1e-18, %v747_v20  ;;  %v396_v11 = vmul.f32 2.0, %v1967_v14  ;;  %v3948_v6 = vsel %vm252_vm1, %v315_v61, 0.0 }
 0x198   : > { %v926_v10 = vsel %vm252_vm1, %v909_v52, 0.0  ;;  %v1228_v2 = vadd.f32 %v1212_v58, %v1171_v57  ;;  %v3952_v1 = vadd.f32 1e-18, %v1339_v29  ;;  %v716_v33 = vmul.f32 %v700_v23, %v700_v23  ;;  %v363_v58 = vpop.permute.xlu0 %362 }
 0x199   : > { %v1058_v43 = vsel %vm462_vm3, %v1052_v36, %v1053_v42  ;;  %v1101_v20 = vrot.slane %v3924_v0, 7  ;;  %v1165_v56 = vrot.slane %v1037_v39, 7  ;;  %v1245_v14 = vrot.slane %v1037_v39, 1 }
 0x19a   : > { %v1148_v5 = vsub.f32 %v1058_v43, %v1107_v26  ;;  %v748_v61 = vadd.f32 %v732_v28, %v716_v33  ;;  %v1213_v53 = vmul.f32 2.0, %v1037_v39  ;;  %v1006_v46 = vadd.f32 %v990_v16, %v926_v10 }
 0x19b   : > { %v974_v52 = vsel %vm253_vm0, %v957_v7, 0.0  ;;  %1920 = vrsqrt.f32 %v3943_v3  ;;  %v1170_v41 = vsel %vm511_vm4, %v1164_v63, %v1165_v56  ;;  %v4378_v29 = vrot.slane %v3847_v13, 1 }
 0x19c   : > { %v1038_v0 = vsub.f32 %v974_v52, %v926_v10  ;;  %1922 = vrsqrt.f32 %v3952_v1  ;;  %v412_v26 = vadd.f32 %v396_v11, %v3948_v6  ;;  %v1022_v23 = vadd.f32 %v1006_v46, %v974_v52 }
 0x19d   : > { %v1250_v36 = vsel %vm462_vm3, %v4378_v29, %v1245_v14  ;;  %v1324_v28 = vmul.f32 %v1148_v5, %v1148_v5  ;;  %v380_v7 = vsel %vm253_vm0, %v363_v58, 0.0  ;;  %vm1427_vm1 = vcmp.eq.f32.partialorder %v3733_v9, 0.0 }
 0x19e   : > { %v1292_v57 = vadd.f32 %v1250_v36, %v1228_v2  ;;  %v1166_v39 = vrot.slane %v1038_v0, 7  ;;  %v1246_v16 = vrot.slane %v1038_v0, 1  ;;  %v3973_v63 = vadd.f32 1e-18, %v748_v61 }
 0x19f   : > { %v1106_v13 = vsel %vm511_vm4, %v1100_v25, %v1101_v20  ;;  %v1229_v10 = vadd.f32 %v1213_v53, %v1170_v41  ;;  %v1214_v33 = vmul.f32 2.0, %v1038_v0  ;;  %v1919_v43 = vpop.eup %1918  ;;  %v1054_v11 = vrot.slane %v1022_v23, 1 }
 0x1a0   : > { %v1308_v29 = vmul.f32 %v1292_v57, %v1292_v57  ;;  %v1102_v2 = vrot.slane %v1022_v23, 7  ;;  %v4379_v46 = vrot.slane %v2543_v32, 7  ;;  %v1169_v30 = vsel %vm511_vm4, %v1165_v56, %v1166_v39 }
 0x1a1   : > { %v4380_v52 = vrot.slane %v2543_v32, 1  ;;  %v428_v25 = vadd.f32 %v412_v26, %v380_v7  ;;  %v4381_v41 = vrot.slane %v2541_v31, 1  ;;  %v1057_v0 = vsel %vm462_vm3, %v1053_v42, %v1054_v11 }
 0x1a2   : > { %v1168_v5 = vsel %vm511_vm4, %v1166_v39, %v4379_v46  ;;  %v1340_v58 = vadd.f32 %v1324_v28, %v1308_v29  ;;  %v4382_v57 = vrot.slane %v2541_v31, 7  ;;  %v1105_v32 = vsel %vm511_vm4, %v1101_v20, %v1102_v2 }
 0x1a3   : > { %v1231_v61 = vadd.f32 %v3641_v4, %v1168_v5  ;;  %v1248_v53 = vsel %vm462_vm3, %v1246_v16, %v4380_v52  ;;  %v1056_v36 = vsel %vm462_vm3, %v1054_v11, %v4381_v41  ;;  %v1149_v56 = vsub.f32 %v1057_v0, %v1106_v13 }
 0x1a4   : > { %v1104_v4 = vsel %vm511_vm4, %v1102_v2, %v4382_v57  ;;  %v1230_v23 = vadd.f32 %v1214_v33, %v1169_v30  ;;  %vm840_vm0 = vcmp.eq.f32.partialorder %v3802_v62, inf  ;;  %v4002_v28 = vadd.f32 1e-18, %v1340_v58 }
 0x1a5   : > { %v1151_v26 = vsub.f32 %v3740_v60, %v1104_v4  ;;  %v1150_v39 = vsub.f32 %v1056_v36, %v1105_v32  ;;  %v1249_v42 = vsel %vm462_vm3, %v1245_v14, %v1246_v16  ;;  %v1295_v31 = vadd.f32 %v3745_v47, %v1231_v61 }
 0x1a6   : > { %1924 = vrsqrt.f32 %v3973_v63  ;;  %v1293_v29 = vadd.f32 %v1249_v42, %v1229_v10  ;;  %v1294_v11 = vadd.f32 %v1248_v53, %v1230_v23  ;;  %v1325_v46 = vmul.f32 %v1149_v56, %v1149_v56 }
 0x1a7   : > { %v508_v20 = vrot.slane %v3867_v8, 7  ;;  %v573_v60 = vrot.slane %v3886_v22, 7  ;;  %1926 = vrsqrt.f32 %v4002_v28  ;;  %v1327_v13 = vmul.f32 %v1151_v26, %v1151_v26 }
 0x1a8   : > { %v1309_v33 = vmul.f32 %v1293_v29, %v1293_v29  ;;  %v1310_v2 = vmul.f32 %v1294_v11, %v1294_v11  ;;  %v1311_v5 = vmul.f32 %v1295_v31, %v1295_v31  ;;  %v1326_v30 = vmul.f32 %v1150_v39, %v1150_v39  ;;  %v1921_v52 = vpop.eup %1920 }
 0x1a9   : > { %v4383_v14 = vand.u32 2147483648, %v3733_v9  ;;  %v444_v16 = vsub.f32 %v380_v7, %v3948_v6  ;;  %v460_v10 = vrot.slane %v428_v25, 1  ;;  %v509_v61 = vrot.slane %v428_v25, 7  ;;  %v1923_v0 = vpop.eup %1922 }
 0x1aa   : > { %v839_v53 = vmul.f32 %v3939_v51, %v3802_v62  ;;  %vm1432_vm14 = vcmp.eq.f32.partialorder %v3877_v19, inf  ;;  %v1341_v58 = vadd.f32 %v1325_v46, %v1309_v33  ;;  %v1342_v41 = vadd.f32 %v1326_v30, %v1310_v2 }
 0x1ab   : > { %v4016_v47 = vsel %vm1427_vm1, %v4383_v14, %v3929_v27  ;;  %v1343_v36 = vadd.f32 %v1327_v13, %v1311_v5  ;;  %v4384_v57 = vrot.slane %v3781_v38, 7  ;;  %v621_v27 = vmul.f32 2.0, %v3886_v22 }
 0x1ac   : > { %v4385_v6 = vrot.slane %v3867_v8, 1  ;;  %v4386_v51 = vrot.slane %v2493_v55, 7  ;;  %v4387_v4 = vrot.slane %v3783_v50, 7  ;;  %v4039_v32 = vadd.f32 1e-18, %v1341_v58 }
 0x1ad   : > { %v514_v9 = vsel %vm511_vm4, %v4384_v57, %v508_v20  ;;  %v4388_v56 = vrot.slane %v2493_v55, 1  ;;  %v513_v26 = vsel %vm511_vm4, %v508_v20, %v509_v61  ;;  %vm1434_vm15 = vcmp.eq.f32.partialorder %v3877_v19, 0.0 }
 0x1ae   : > { %v464_v7 = vsel %vm462_vm3, %v4385_v6, %v460_v10  ;;  %v512_v25 = vsel %vm511_vm4, %v509_v61, %v4386_v51  ;;  %v578_v38 = vsel %vm511_vm4, %v4387_v4, %v573_v60  ;;  %v4048_v23 = vadd.f32 1e-18, %v1342_v41 }
 0x1af   : > { %v463_v8 = vsel %vm462_vm3, %v460_v10, %v4388_v56  ;;  %v559_v39 = vsub.f32 %v3654_v17, %v512_v25  ;;  %v574_v50 = vrot.slane %v444_v16, 7  ;;  %v622_v42 = vmul.f32 2.0, %v444_v16 }
 0x1b0   : > { %v841_v31 = vsel %vm840_vm0, %v3802_v62, %v839_v53  ;;  %v1431_v55 = vmul.f32 %v1919_v43, %v3877_v19  ;;  %v4055_v29 = vadd.f32 1e-18, %v1343_v36  ;;  %v557_v11 = vsub.f32 %v464_v7, %v514_v9 }
 0x1b1   : > { %vm842_vm2 = vcmp.eq.f32.partialorder %v3802_v62, 0.0  ;;  %v558_v46 = vsub.f32 %v463_v8, %v513_v26  ;;  %v4389_v20 = vrot.slane %v2484_v49, 7  ;;  %v577_v17 = vsel %vm511_vm4, %v573_v60, %v574_v50 }
 0x1b2   : > { %v654_v33 = vrot.slane %v444_v16, 1  ;;  %vm847_vm5 = vcmp.eq.f32.partialorder %v3943_v3, inf  ;;  %v637_v2 = vadd.f32 %v621_v27, %v578_v38  ;;  %1928 = vrsqrt.f32 %v4039_v32 }
 0x1b3   : > { %v576_v13 = vsel %vm511_vm4, %v574_v50, %v4389_v20  ;;  %v638_v43 = vadd.f32 %v622_v42, %v577_v17  ;;  %v850_v30 = vand.u32 2147483648, %v3943_v3  ;;  %1930 = vrsqrt.f32 %v4048_v23 }
 0x1b4   : > { %v639_v5 = vadd.f32 %v3546_v45, %v576_v13  ;;  %v4390_v14 = vrot.slane %v2484_v49, 1  ;;  %v4391_v60 = vrot.slane %v3886_v22, 1  ;;  %v733_v41 = vmul.f32 %v557_v11, %v557_v11  ;;  %v1925_v45 = vpop.eup %1924 }
 0x1b5   : > { %v1433_v36 = vsel %vm1432_vm14, %v3877_v19, %v1431_v55  ;;  %v1438_v49 = vmul.f32 %v1923_v0, %v3952_v1  ;;  %1932 = vrsqrt.f32 %v4055_v29  ;;  %v734_v57 = vmul.f32 %v558_v46, %v558_v46  ;;  %v1927_v9 = vpop.eup %1926 }
 0x1b6   : > { %v656_v10 = vsel %vm462_vm3, %v654_v33, %v4390_v14  ;;  %v657_v16 = vsel %vm462_vm3, %v4391_v60, %v654_v33  ;;  %v703_v58 = vadd.f32 %v3626_v21, %v639_v5  ;;  %v735_v6 = vmul.f32 %v559_v39, %v559_v39 }
 0x1b7   : > { %v701_v61 = vadd.f32 %v657_v16, %v637_v2  ;;  %v702_v53 = vadd.f32 %v656_v10, %v638_v43  ;;  %v846_v7 = vmul.f32 %v1921_v52, %v3943_v3  ;;  %vm1439_vm3 = vcmp.eq.f32.partialorder %v3952_v1, inf }
 0x1b8   : > { %v719_v40 = vmul.f32 %v703_v58, %v703_v58  ;;  %vm1441_vm4 = vcmp.eq.f32.partialorder %v3952_v1, 0.0  ;;  %v1445_v21 = vmul.f32 %v1927_v9, %v4002_v28  ;;  %v4392_v0 = vand.u32 2147483648, %v3877_v19 }
 0x1b9   : > { %v717_v22 = vmul.f32 %v701_v61, %v701_v61  ;;  %v718_v27 = vmul.f32 %v702_v53, %v702_v53  ;;  %v1440_v56 = vsel %vm1439_vm3, %v3952_v1, %v1438_v49  ;;  %v1442_v8 = vand.u32 2147483648, %v3952_v1 }
 0x1ba   : > { %v751_v4 = vadd.f32 %v735_v6, %v719_v40  ;;  %v1436_v38 = vsel %vm1434_vm15, %v4392_v0, %v1433_v36  ;;  %v853_v52 = vmul.f32 %v1925_v45, %v3973_v63  ;;  %vm1446_vm6 = vcmp.eq.f32.partialorder %v4002_v28, inf }
 0x1bb   : > { %v749_v51 = vadd.f32 %v733_v41, %v717_v22  ;;  %v750_v25 = vadd.f32 %v734_v57, %v718_v27  ;;  %v4393_v42 = vand.u32 2147483648, %v3802_v62  ;;  %v848_v55 = vsel %vm847_vm5, %v3943_v3, %v846_v7 }
 0x1bc   : > { %v4099_v50 = vadd.f32 1e-18, %v751_v4  ;;  %v1447_v11 = vsel %vm1446_vm6, %v4002_v28, %v1445_v21  ;;  %v1481_v46 = vsub.f32 %v4016_v47, %v3871_v34  ;;  %vm854_vm7 = vcmp.eq.f32.partialorder %v3973_v63, inf }
 0x1bd   : > { %v4095_v26 = vadd.f32 1e-18, %v749_v51  ;;  %v4097_v39 = vadd.f32 1e-18, %v750_v25  ;;  %v844_v19 = vsel %vm842_vm2, %v4393_v42, %v841_v31  ;;  %v1449_v13 = vand.u32 2147483648, %v4002_v28 }
 0x1be   : > { %v1482_v20 = vsub.f32 %v1436_v38, %v844_v19  ;;  %v1443_v62 = vsel %vm1441_vm4, %v1442_v8, %v1440_v56  ;;  %vm849_vm8 = vcmp.eq.f32.partialorder %v3943_v3, 0.0  ;;  %v855_v31 = vsel %vm854_vm7, %v3973_v63, %v853_v52 }
 0x1bf   : > { %1934 = vrsqrt.f32 %v4095_v26  ;;  %vm1448_vm9 = vcmp.eq.f32.partialorder %v4002_v28, 0.0  ;;  %v857_v34 = vand.u32 2147483648, %v3973_v63  ;;  %v851_v47 = vsel %vm849_vm8, %v850_v30, %v848_v55  ;;  %v1929_v33 = vpop.eup %1928 }
 0x1c0   : > { %1936 = vrsqrt.f32 %v4097_v39  ;;  %v1450_v17 = vsel %vm1448_vm9, %v1449_v13, %v1447_v11  ;;  %vm1509_vm10 = vcmp.eq.f32.partialorder %v3453_v48, 0.0  ;;  %vm856_vm11 = vcmp.eq.f32.partialorder %v3973_v63, 0.0  ;;  %v1931_v2 = vpop.eup %1930 }
 0x1c1   : > { %1938 = vrsqrt.f32 %v4099_v50  ;;  %v1483_v1 = vsub.f32 %v1443_v62, %v851_v47  ;;  %v4125_v3 = vsel %vm1509_vm10, 0.0, %v3749_v35  ;;  %v4128_v43 = vadd.f32 1e-18, %v3826_v44 }
 0x1c2   : > { %v858_v28 = vsel %vm856_vm11, %v857_v34, %v855_v31  ;;  %v4130_v5 = vmul.f32 %v1481_v46, %v1481_v46  ;;  %vm1453_vm12 = vcmp.eq.f32.partialorder %v4039_v32, inf  ;;  %v1456_v30 = vand.u32 2147483648, %v4039_v32  ;;  %v1933_v14 = vpop.eup %1932 }
 0x1c3   : > { %vm1455_vm13 = vcmp.eq.f32.partialorder %v4039_v32, 0.0  ;;  %v1484_v48 = vsub.f32 %v1450_v17, %v858_v28  ;;  %v1452_v63 = vmul.f32 %v1929_v33, %v4039_v32  ;;  %vm1460_vm1 = vcmp.eq.f32.partialorder %v4048_v23, inf }
 0x1c4   : > { %vm1462_vm0 = vcmp.eq.f32.partialorder %v4048_v23, 0.0  ;;  %v4138_v35 = vmul.f32 %v1482_v20, %v1482_v20  ;;  %v1463_v10 = vand.u32 2147483648, %v4048_v23  ;;  %vm1467_vm14 = vcmp.eq.f32.partialorder %v4055_v29, inf }
 0x1c5   : > { %v1470_v60 = vand.u32 2147483648, %v4055_v29  ;;  %v4143_v16 = vmul.f32 %v1483_v1, %v1483_v1  ;;  %v1459_v61 = vmul.f32 %v1931_v2, %v4048_v23  ;;  %vm861_vm15 = vcmp.eq.f32.partialorder %v4095_v26, inf }
 0x1c6   : > { %v864_v53 = vand.u32 2147483648, %v4095_v26  ;;  %vm1469_vm2 = vcmp.eq.f32.partialorder %v4055_v29, 0.0  ;;  %v4150_v58 = vadd.f32 1e-18, %v4130_v5  ;;  %vm863_vm5 = vcmp.eq.f32.partialorder %v4095_v26, 0.0 }
 0x1c7   : > { %vm868_vm3 = vcmp.eq.f32.partialorder %v4097_v39, inf  ;;  %v4154_v41 = vmul.f32 %v1484_v48, %v1484_v48  ;;  %v1579_v45 = vmul.f32 %v3850_v24, %v3713_v59  ;;  %vm1510_vm4 = vcmp.eq.f32.partialorder %v3659_v54, 0.0 }
 0x1c8   : > { %vm870_vm6 = vcmp.eq.f32.partialorder %v4097_v39, 0.0  ;;  %v1454_v36 = vsel %vm1453_vm12, %v4039_v32, %v1452_v63  ;;  %v1466_v49 = vmul.f32 %v1933_v14, %v4055_v29  ;;  %v4165_v57 = vadd.f32 1e-18, %v4138_v35 }
 0x1c9   : > { %v871_v9 = vand.u32 2147483648, %v4097_v39  ;;  %vm875_vm7 = vcmp.eq.f32.partialorder %v4099_v50, inf  ;;  %v4170_v22 = vadd.f32 1e-18, %v4143_v16  ;;  %1940 = vrsqrt.f32 %v4128_v43 }
 0x1ca   : > { %vm877_vm8 = vcmp.eq.f32.partialorder %v4099_v50, 0.0  ;;  %v1461_v24 = vsel %vm1460_vm1, %v4048_v23, %v1459_v61  ;;  %vm1580_vm9 = vcmp.eq.f32.partialorder %v3713_v59, inf  ;;  %1942 = vrsqrt.f32 %v4150_v58 }
 0x1cb   : > { %v878_v40 = vand.u32 2147483648, %v4099_v50  ;;  %v1457_v6 = vsel %vm1455_vm13, %v1456_v30, %v1454_v36  ;;  %v4183_v7 = vadd.f32 1e-18, %v4154_v41  ;;  %v1581_v21 = vsel %vm1580_vm9, %v3713_v59, %v1579_v45 }
 0x1cc   : > { %v1935_v27 = vpop.eup %1934  ;;  %v1468_v4 = vsel %vm1467_vm14, %v4055_v29, %v1466_v49  ;;  %v1583_v0 = vand.u32 2147483648, %v3713_v59  ;;  %1944 = vrsqrt.f32 %v4165_v57  ;;  %v1464_v56 = vsel %vm1462_vm0, %v1463_v10, %v1461_v24 }
 0x1cd   : > { %v1937_v51 = vpop.eup %1936  ;;  %v860_v25 = vmul.f32 %v1935_v27, %v4095_v26  ;;  %vm1582_vm10 = vcmp.eq.f32.partialorder %v3713_v59, 0.0  ;;  %1946 = vrsqrt.f32 %v4170_v22  ;;  %v1586_v19 = vmul.f32 %v3888_v18, %v3753_v15 }
 0x1ce   : > { %v1939_v38 = vpop.eup %1938  ;;  %v867_v32 = vmul.f32 %v1937_v51, %v4097_v39  ;;  %v1584_v42 = vsel %vm1582_vm10, %v1583_v0, %v1581_v21  ;;  %v1471_v59 = vsel %vm1469_vm2, %v1470_v60, %v1468_v4  ;;  %1948 = vrsqrt.f32 %v4183_v7 }
 0x1cf   : > { %v862_v8 = vsel %vm861_vm15, %v4095_v26, %v860_v25  ;;  %v874_v52 = vmul.f32 %v1939_v38, %v4099_v50  ;;  %vm1511_vm11 = vcmp.eq.f32.partialorder %v3718_v37, 0.0  ;;  %vm1587_vm12 = vcmp.eq.f32.partialorder %v3753_v15, inf }
 0x1d0   : > { %v865_v55 = vsel %vm863_vm5, %v864_v53, %v862_v8  ;;  %v869_v23 = vsel %vm868_vm3, %v4097_v39, %v867_v32  ;;  %v1654_v29 = vsel %vm1510_vm4, 0.0, %v1584_v42  ;;  %v1588_v39 = vsel %vm1587_vm12, %v3753_v15, %v1586_v19 }
 0x1d1   : > { %v872_v11 = vsel %vm870_vm6, %v871_v9, %v869_v23  ;;  %v876_v46 = vsel %vm875_vm7, %v4099_v50, %v874_v52  ;;  %v1485_v18 = vsub.f32 %v1457_v6, %v865_v55  ;;  %v1668_v31 = vadd.f32 %v3437_v12, %v4125_v3 }
 0x1d2   : > { %v879_v26 = vsel %vm877_vm8, %v878_v40, %v876_v46  ;;  %v1486_v20 = vsub.f32 %v1464_v56, %v872_v11  ;;  %vm1512_vm13 = vcmp.eq.f32.partialorder %v3826_v44, 0.0  ;;  %vm1513_vm1 = vcmp.eq.f32.partialorder %v4130_v5, 0.0 }
 0x1d3   : > { %v1487_v13 = vsub.f32 %v1471_v59, %v879_v26  ;;  %v4222_v62 = vmul.f32 %v1485_v18, %v1485_v18  ;;  %v1590_v50 = vand.u32 2147483648, %v3753_v15  ;;  %vm1589_vm0 = vcmp.eq.f32.partialorder %v3753_v15, 0.0 }
 0x1d4   : > { %v4227_v34 = vmul.f32 %v1486_v20, %v1486_v20  ;;  %v1669_v17 = vadd.f32 %v1668_v31, %v1654_v29  ;;  %vm1514_vm14 = vcmp.eq.f32.partialorder %v4138_v35, 0.0  ;;  %vm1594_vm15 = vcmp.eq.f32.partialorder %v4128_v43, inf }
 0x1d5   : > { %v4232_v47 = vmul.f32 %v1487_v13, %v1487_v13  ;;  %v4235_v54 = vadd.f32 1e-18, %v4222_v62  ;;  %v1591_v33 = vsel %vm1589_vm0, %v1590_v50, %v1588_v39  ;;  %vm1596_vm2 = vcmp.eq.f32.partialorder %v4128_v43, 0.0 }
 0x1d6   : > { %v4240_v12 = vadd.f32 1e-18, %v4227_v34  ;;  %v1941_v1 = vpop.eup %1940  ;;  %v1597_v3 = vand.u32 2147483648, %v4128_v43  ;;  %vm1601_vm5 = vcmp.eq.f32.partialorder %v4150_v58, inf  ;;  %vm1603_vm3 = vcmp.eq.f32.partialorder %v4150_v58, 0.0 }
 0x1d7   : > { %v4244_v2 = vadd.f32 1e-18, %v4232_v47  ;;  %1950 = vrsqrt.f32 %v4235_v54  ;;  %v1943_v15 = vpop.eup %1942  ;;  %v1593_v28 = vmul.f32 %v1941_v1, %v4128_v43  ;;  %v1604_v48 = vand.u32 2147483648, %v4150_v58 }
 0x1d8   : > { %1952 = vrsqrt.f32 %v4240_v12  ;;  %v1600_v30 = vmul.f32 %v1943_v15, %v4150_v58  ;;  %vm1608_vm4 = vcmp.eq.f32.partialorder %v4165_v57, inf  ;;  %v1655_v14 = vsel %vm1511_vm11, 0.0, %v1591_v33 }
 0x1d9   : > { %v1945_v63 = vpop.eup %1944  ;;  %v1595_v10 = vsel %vm1594_vm15, %v4128_v43, %v1593_v28  ;;  %vm1610_vm6 = vcmp.eq.f32.partialorder %v4165_v57, 0.0  ;;  %v1611_v60 = vand.u32 2147483648, %v4165_v57  ;;  %1954 = vrsqrt.f32 %v4244_v2 }
 0x1da   : > { %v1947_v61 = vpop.eup %1946  ;;  %v1598_v53 = vsel %vm1596_vm2, %v1597_v3, %v1595_v10  ;;  %v1602_v45 = vsel %vm1601_vm5, %v4150_v58, %v1600_v30  ;;  %v1607_v37 = vmul.f32 %v1945_v63, %v4165_v57  ;;  %vm1615_vm7 = vcmp.eq.f32.partialorder %v4170_v22, inf }
 0x1db   : > { %v1605_v36 = vsel %vm1603_vm3, %v1604_v48, %v1602_v45  ;;  %v1614_v49 = vmul.f32 %v1947_v61, %v4170_v22  ;;  %v1656_v9 = vsel %vm1512_vm13, 0.0, %v1598_v53  ;;  %v1670_v24 = vadd.f32 %v1669_v17, %v1655_v14  ;;  %v1949_v27 = vpop.eup %1948 }
 0x1dc   : > { %v1609_v43 = vsel %vm1608_vm4, %v4165_v57, %v1607_v37  ;;  %vm1617_vm8 = vcmp.eq.f32.partialorder %v4170_v22, 0.0  ;;  %v1618_v40 = vand.u32 2147483648, %v4170_v22  ;;  %v1657_v6 = vsel %vm1513_vm1, 0.0, %v1605_v36 }
 0x1dd   : > { %v1612_v58 = vsel %vm1610_vm6, %v1611_v60, %v1609_v43  ;;  %v1616_v21 = vsel %vm1615_vm7, %v4170_v22, %v1614_v49  ;;  %v1621_v44 = vmul.f32 %v1949_v27, %v4183_v7  ;;  %v1671_v51 = vadd.f32 %v1670_v24, %v1656_v9 }
 0x1de   : > { %v1619_v25 = vsel %vm1617_vm8, %v1618_v40, %v1616_v21  ;;  %vm1622_vm9 = vcmp.eq.f32.partialorder %v4183_v7, inf  ;;  %v1658_v4 = vsel %vm1514_vm14, 0.0, %v1612_v58  ;;  %vm1515_vm10 = vcmp.eq.f32.partialorder %v4143_v16, 0.0 }
 0x1df   : > { %v1623_v0 = vsel %vm1622_vm9, %v4183_v7, %v1621_v44  ;;  %v1625_v5 = vand.u32 2147483648, %v4183_v7  ;;  %v1672_v38 = vadd.f32 %v1671_v51, %v1657_v6  ;;  %vm1624_vm11 = vcmp.eq.f32.partialorder %v4183_v7, 0.0 }
 0x1e0   : > { %v1659_v57 = vsel %vm1515_vm10, 0.0, %v1619_v25  ;;  %vm1516_vm12 = vcmp.eq.f32.partialorder %v4154_v41, 0.0  ;;  %vm1517_vm13 = vcmp.eq.f32.partialorder %v4222_v62, 0.0  ;;  %vm1518_vm1 = vcmp.eq.f32.partialorder %v4227_v34, 0.0 }
 0x1e1   : > { %v1626_v22 = vsel %vm1624_vm11, %v1625_v5, %v1623_v0  ;;  %v1673_v32 = vadd.f32 %v1672_v38, %v1658_v4  ;;  %vm1629_vm0 = vcmp.eq.f32.partialorder %v4235_v54, inf  ;;  %vm1631_vm14 = vcmp.eq.f32.partialorder %v4235_v54, 0.0 }
 0x1e2   : > { %v1660_v16 = vsel %vm1516_vm12, 0.0, %v1626_v22  ;;  %v1632_v7 = vand.u32 2147483648, %v4235_v54  ;;  %vm1636_vm15 = vcmp.eq.f32.partialorder %v4240_v12, inf  ;;  %vm1638_vm2 = vcmp.eq.f32.partialorder %v4240_v12, 0.0 }
 0x1e3   : > { %v1674_v8 = vadd.f32 %v1673_v32, %v1659_v57  ;;  %v1639_v55 = vand.u32 2147483648, %v4240_v12  ;;  %vm1643_vm5 = vcmp.eq.f32.partialorder %v4244_v2, inf  ;;  %v1646_v26 = vand.u32 2147483648, %v4244_v2 }
 0x1e4   : > { %v1951_v56 = vpop.eup %1950  ;;  %vm1645_vm3 = vcmp.eq.f32.partialorder %v4244_v2, 0.0  ;;  %vm1519_vm4 = vcmp.eq.f32.partialorder %v4232_v47, 0.0 }
 0x1e5   : > { %v1953_v52 = vpop.eup %1952  ;;  %v1628_v35 = vmul.f32 %v1951_v56, %v4235_v54  ;;  %v1675_v46 = vadd.f32 %v1674_v8, %v1660_v16 }
 0x1e6   : > { %v1635_v42 = vmul.f32 %v1953_v52, %v4240_v12  ;;  %v1955_v19 = vpop.eup %1954 }
 0x1e7   : > { %v1630_v41 = vsel %vm1629_vm0, %v4235_v54, %v1628_v35  ;;  %v1642_v11 = vmul.f32 %v1955_v19, %v4244_v2 }
 0x1e8   : > { %v1633_v23 = vsel %vm1631_vm14, %v1632_v7, %v1630_v41  ;;  %v1637_v59 = vsel %vm1636_vm15, %v4240_v12, %v1635_v42 }
 0x1e9   : > { %v1640_v18 = vsel %vm1638_vm2, %v1639_v55, %v1637_v59  ;;  %v1661_v20 = vsel %vm1517_vm13, 0.0, %v1633_v23  ;;  %v1644_v29 = vsel %vm1643_vm5, %v4244_v2, %v1642_v11 }
 0x1ea   : > { %v1662_v13 = vsel %vm1518_vm1, 0.0, %v1640_v18  ;;  %v1676_v39 = vadd.f32 %v1675_v46, %v1661_v20  ;;  %v1647_v31 = vsel %vm1645_vm3, %v1646_v26, %v1644_v29 }
 0x1eb   : > { %v1663_v54 = vsel %vm1519_vm4, 0.0, %v1647_v31 }
 0x1ec   : > { %v1677_v50 = vadd.f32 %v1676_v39, %v1662_v13 }
 0x1ee   : > { %v1678_v17 = vadd.f32 %v1677_v50, %v1663_v54 }
 0x1f0   : > { %v1679_v12 = vrot.slane %v1678_v17, 4 }
 0x1f2   : > { %v1680_v62 = vadd.f32 %v1679_v12, %v1678_v17 }
 0x1f4   : > { %v1681_v33 = vrot.slane %v1680_v62, 2 }
 0x1f6   : > { %v1682_v1 = vadd.f32 %v1681_v33, %v1680_v62 }
 0x1f8   : > { %v1683_v2 = vrot.slane %v1682_v1, 1 }
 0x1fa   : > { %v1684_v3 = vadd.f32 %v1683_v2, %v1682_v1 }
 0x1fc   : > { %1685 = vst [vmem:[%s200_s14] sm:$0x1] %v1684_v3 }
 0x1fd   : > { %2037 = shalt.err (!%p2034_p4)
}
 0x1fe   : > { %s2038_s8 = scalar_lea.hbm %s1697_s26, 16  ;;  %s2042_s4 = scalar_lea.hbm %s4353_s2, 32 }
 0x1ff   : > { %p2039_p9 = scmp.ne.s32.totalorder %s1697_s26, %s2038_s8  ;;  %p2043_p5 = scmp.lt.s32.totalorder %s1697_s26, %s4353_s2 }
 0x200   : > { %p2044_p8 = scmp.lt.s32.totalorder %s2042_s4, %s2038_s8 }
 0x201   : > { %p2040_p11 = pnand %p2039_p9, %p4394_p1 }
 0x202   : > { %p2045_p6 = por %p2044_p8, %p2043_p5 }
 0x203   : > { %p2041_p3 = pneg %p2040_p11 }
 0x205   : > { %p2046_p13 = pnand %p2045_p6, %p2041_p3 }
 0x207   : > { %2049 = shalt.err (!%p2046_p13)
}
 0x208   : > { %1809 = dma.vmem_to_hbm [thread:$0]  (%p4394_p1), %s1700_s17, 16, %s1697_s26, %s1687_s27  }
 0x209 PF: > { %s1711_s29 = sand.u32 1, %s2080_s9   ;;  %p4395_p12 = scmp.ne.s32.totalorder %s4373_s22, 0 }
 0x20a   : > { %p4396_p7 = scmp.ge.s32.totalorder %s2092_s12, 2  ;;  %s1712_s5 = scalar_lea.sflag [#allocation4], %s1711_s29 }
 0x20c   : > { %p1819_p10 = pnand %p4396_p7, %p4395_p12 }
 0x20e   : > { %p1820_p0 = pneg %p1819_p10 }
 0x210   : > { %2075 = dma.done.wait (%p1820_p0), %s1712_s5, 16  }
 0x211   : > { %2077 = vsyncadd (%p1820_p0), %s1712_s5, 4294967280  ;;  %p18_p2 = scmp.ge.s32.totalorder %s2141_s15, 4   ;;  %s4397_s9 = smov %s2084_s10 }
 0x212   : > { %s4398_s10 = smov %s2088_s11  ;;  %s4399_s11 = smov %s2153_s18 }
 0x213   : > { %s4400_s12 = smov %s2141_s15  ;;  %20 = sbr.rel (!%p18_p2) target bundleno = 7 (0x7), region = 86 }
 0x218   :  { %1716 = vsyncpa [#allocation3], 1 }
 0x219   :  { %1718 = vsyncpa [#allocation3 + $0x1], 1 }
 0x21a   :  { %1719 = vsyncpa [#allocation6], 1 }
 0x21b   :  { %1721 = vsyncpa [#allocation6 + $0x1], 1 }
 0x21c   :  { %1722 = vsyncpa [#allocation4], 1 }
 0x21d   :  { %1724 = vsyncpa [#allocation4 + $0x1], 1 }

</bundles_post_ra>
